<compile_context>
chip_gen: v7x
topology: tpu7x:2x2x1
jax: 0.10.0
libtpu: 0.0.40
codegen_flags: <defaults>
</compile_context>

<pallas_src>
import jax
import jax.numpy as jnp
from jax.experimental import pallas as pl
from jax.experimental.pallas import tpu as pltpu

F_IN = 69      # real input feature count
F_PAD = 128    # padded input features (layer-1 MXU K dim, sublane dim of x^T)
OUT_PAD = 8    # final layer out-features padded 1 -> 8 (sublane-aligned M)


def _mlp_kernel(x_ref,
                w1_ref, b1_ref,
                w2_ref, b2_ref,
                w3_ref, b3_ref,
                w4_ref, b4_ref,
                w5_ref, b5_ref,
                o_ref):
    """Fused forward for one feature-major batch tile.

    x_ref:  (F_PAD, tb)  input tile (matmul dtype)
    w*_ref: PyTorch-layout weights (out, in), b*_ref: (out, 1) f32
    o_ref:  (1, tb) f32  sigmoid(MLP(x)) for this tile (lane-dense store)
    """
    cdt = w1_ref.dtype  # matmul operand dtype (bf16 or f32); accumulate in f32

    x = x_ref[...]                                                     # (128, tb)
    h = jnp.dot(w1_ref[...], x, preferred_element_type=jnp.float32) + b1_ref[...]
    h = jnp.maximum(h, 0.0)                                            # (128, tb) f32

    h = jnp.dot(w2_ref[...], h.astype(cdt),
                preferred_element_type=jnp.float32) + b2_ref[...]
    h = jnp.maximum(h, 0.0)                                            # (512, tb)

    h = jnp.dot(w3_ref[...], h.astype(cdt),
                preferred_element_type=jnp.float32) + b3_ref[...]
    h = jnp.maximum(h, 0.0)                                            # (128, tb)

    h = jnp.dot(w4_ref[...], h.astype(cdt),
                preferred_element_type=jnp.float32) + b4_ref[...]
    h = jnp.maximum(h, 0.0)                                            # (512, tb)

    z8 = jnp.dot(w5_ref[...], h.astype(cdt),
                 preferred_element_type=jnp.float32) + b5_ref[...]     # (8, tb)
    z = z8[0:1, :]                                                     # (1, tb): row 0 is real
    # exact sigmoid — cheap now that it runs on a single lane-dense row
    o_ref[...] = (1.0 / (1.0 + jnp.exp(-z))).astype(o_ref.dtype)


def eval_forward(x, params, *, block_b=2048, matmul_dtype=jnp.bfloat16):
    """x: (B, 69) float32.  Returns (B, 1) float32 = sigmoid(MLP(x)).

    params are in PyTorch layout: W_i (out, in), b_i (out,).
    """
    (w1, b1, w2, b2, w3, b3, w4, b4, w5, b5) = params
    B = x.shape[0]
    cdt = matmul_dtype

    # --- batch tiling: tb multiple of 128 (lane-dense x / out tiles) --------
    n_tiles = max(1, pl.cdiv(B, block_b))
    tb = ((pl.cdiv(B, n_tiles) + 127) // 128) * 128
    b_pad = n_tiles * tb

    # --- weight / bias prep (all zero-fill pads: math is exact) -------------
    w1p = jnp.pad(w1, ((0, 0), (0, F_PAD - F_IN))).astype(cdt)   # (128, 128)
    w2c = w2.astype(cdt)                                         # (512, 128)
    w3c = w3.astype(cdt)                                         # (128, 512)
    w4c = w4.astype(cdt)                                         # (512, 128)
    w5p = jnp.pad(w5, ((0, OUT_PAD - 1), (0, 0))).astype(cdt)    # (8, 512)
    b1c = b1.reshape(-1, 1).astype(jnp.float32)
    b2c = b2.reshape(-1, 1).astype(jnp.float32)
    b3c = b3.reshape(-1, 1).astype(jnp.float32)
    b4c = b4.reshape(-1, 1).astype(jnp.float32)
    b5c = jnp.pad(b5.reshape(-1, 1), ((0, OUT_PAD - 1), (0, 0))).astype(jnp.float32)

    # --- input: transpose to feature-major + cast + pad (one fused XLA op) --
    xt = jnp.pad(x.T.astype(cdt), ((0, F_PAD - F_IN), (0, b_pad - B)))  # (128, b_pad)

    grid = (n_tiles,)

    def tile_spec(shape):   # x / out: march over batch tiles (last dim)
        return pl.BlockSpec(shape, lambda i: (0, i))

    def pin_spec(shape):    # weights / biases: constant block -> DMA'd once
        return pl.BlockSpec(shape, lambda i: (0, 0))

    out = pl.pallas_call(
        _mlp_kernel,
        out_shape=jax.ShapeDtypeStruct((1, b_pad), jnp.float32),
        grid=grid,
        in_specs=[
            tile_spec((F_PAD, tb)),
            pin_spec(w1p.shape), pin_spec(b1c.shape),
            pin_spec(w2c.shape), pin_spec(b2c.shape),
            pin_spec(w3c.shape), pin_spec(b3c.shape),
            pin_spec(w4c.shape), pin_spec(b4c.shape),
            pin_spec(w5p.shape), pin_spec(b5c.shape),
        ],
        out_specs=tile_spec((1, tb)),
        compiler_params=pltpu.CompilerParams(
            dimension_semantics=("parallel",),        # v7x: shard tiles over 2 TCs
            vmem_limit_bytes=48 * 1024 * 1024,        # fits tb<=4096 workset, < v7x 64 MiB
        ),
    )(xt, w1p, b1c, w2c, b2c, w3c, b3c, w4c, b4c, w5p, b5c)

    # only the first B lanes of the single output row are real
    return out[0, :B].reshape(B, 1)


# --------------------------- params / reference -----------------------------

def _init_linear(key, fan_in, fan_out):
    """PyTorch-style uniform(-1/sqrt(fan_in), 1/sqrt(fan_in)) init, (out,in) layout."""
    kw, kb = jax.random.split(key)
    bound = 1.0 / (fan_in ** 0.5)
    w = jax.random.uniform(kw, (fan_out, fan_in), jnp.float32, -bound, bound)
    b = jax.random.uniform(kb, (fan_out,), jnp.float32, -bound, bound)
    return w, b


def make_params(key):
    dims = [(69, 128), (128, 512), (512, 128), (128, 512), (512, 1)]
    keys = jax.random.split(key, len(dims))
    params = []
    for k, (fi, fo) in zip(keys, dims):
        w, b = _init_linear(k, fi, fo)
        params.extend([w, b])
    return tuple(params)


def _reference(x, params):
    (w1, b1, w2, b2, w3, b3, w4, b4, w5, b5) = params
    h = jnp.maximum(x @ w1.T + b1, 0.0)
    h = jnp.maximum(h @ w2.T + b2, 0.0)
    h = jnp.maximum(h @ w3.T + b3, 0.0)
    h = jnp.maximum(h @ w4.T + b4, 0.0)
    z = h @ w5.T + b5
    return 1.0 / (1.0 + jnp.exp(-z))


if __name__ == "__main__":
    key = jax.random.PRNGKey(0)
    kx, kp = jax.random.split(key)
    params = make_params(kp)

    # small batch, single tile, default bf16 matmul operands
    B = 8
    x = jax.random.normal(kx, (B, F_IN), dtype=jnp.float32)
    out = jax.block_until_ready(eval_forward(x, params))
    ref = _reference(x, params)
    assert out.shape == (B, 1), out.shape
    assert jnp.allclose(out, ref, atol=5e-2, rtol=5e-2), (out, ref)

    # multi-tile grid with batch padding (exercises pipeline + megacore path)
    B2 = 300
    x2 = jax.random.normal(kx, (B2, F_IN), dtype=jnp.float32)
    out2 = jax.block_until_ready(eval_forward(x2, params, block_b=128))
    ref2 = _reference(x2, params)
    assert out2.shape == (B2, 1), out2.shape
    assert jnp.allclose(out2, ref2, atol=5e-2, rtol=5e-2)

    # exact f32 operand path — tight tolerance
    out3 = jax.block_until_ready(
        eval_forward(x2, params, block_b=128, matmul_dtype=jnp.float32))
    assert out3.shape == (B2, 1), out3.shape
    assert jnp.allclose(out3, ref2, atol=5e-3, rtol=1e-3)

    print("KERNEL_OK")
</pallas_src>

<mosaic_0001>
module attributes {stable_mosaic.version = 11 : i64} {
  func.func @_mlp_kernel(%arg0: i32, %arg1: memref<128x128xbf16, #tpu.memory_space<vmem>>, %arg2: memref<128x128xbf16, #tpu.memory_space<vmem>>, %arg3: memref<128x1xf32, #tpu.memory_space<vmem>>, %arg4: memref<512x128xbf16, #tpu.memory_space<vmem>>, %arg5: memref<512x1xf32, #tpu.memory_space<vmem>>, %arg6: memref<128x512xbf16, #tpu.memory_space<vmem>>, %arg7: memref<128x1xf32, #tpu.memory_space<vmem>>, %arg8: memref<512x128xbf16, #tpu.memory_space<vmem>>, %arg9: memref<512x1xf32, #tpu.memory_space<vmem>>, %arg10: memref<8x512xbf16, #tpu.memory_space<vmem>>, %arg11: memref<8x1xf32, #tpu.memory_space<vmem>>, %arg12: memref<1x128xf32, #tpu.memory_space<vmem>>) attributes {dimension_semantics = [#tpu.dimension_semantics<parallel>], iteration_bounds = array<i64: 1>, scalar_prefetch = 0 : i64, scratch_operands = 0 : i64, tpu.core_type = #tpu.core_type<tc>, window_params = [{transform_indices = @transform_0, window_bounds = array<i64: 128, 128>}, {pipeline_mode = #tpu.pipeline_mode<synchronous>, transform_indices = @transform_1, window_bounds = array<i64: 128, 128>}, {pipeline_mode = #tpu.pipeline_mode<synchronous>, transform_indices = @transform_2, window_bounds = array<i64: 128, 1>}, {pipeline_mode = #tpu.pipeline_mode<synchronous>, transform_indices = @transform_3, window_bounds = array<i64: 512, 128>}, {pipeline_mode = #tpu.pipeline_mode<synchronous>, transform_indices = @transform_4, window_bounds = array<i64: 512, 1>}, {pipeline_mode = #tpu.pipeline_mode<synchronous>, transform_indices = @transform_5, window_bounds = array<i64: 128, 512>}, {pipeline_mode = #tpu.pipeline_mode<synchronous>, transform_indices = @transform_6, window_bounds = array<i64: 128, 1>}, {pipeline_mode = #tpu.pipeline_mode<synchronous>, transform_indices = @transform_7, window_bounds = array<i64: 512, 128>}, {pipeline_mode = #tpu.pipeline_mode<synchronous>, transform_indices = @transform_8, window_bounds = array<i64: 512, 1>}, {pipeline_mode = #tpu.pipeline_mode<synchronous>, transform_indices = @transform_9, window_bounds = array<i64: 8, 512>}, {pipeline_mode = #tpu.pipeline_mode<synchronous>, transform_indices = @transform_10, window_bounds = array<i64: 8, 1>}, {transform_indices = @transform_11, window_bounds = array<i64: 1, 128>}]} {
    %c0 = arith.constant 0 : index
    %c0_0 = arith.constant 0 : index
    %0 = vector.load %arg1[%c0, %c0_0] : memref<128x128xbf16, #tpu.memory_space<vmem>>, vector<128x128xbf16>
    %c0_1 = arith.constant 0 : index
    %c0_2 = arith.constant 0 : index
    %1 = vector.load %arg2[%c0_1, %c0_2] : memref<128x128xbf16, #tpu.memory_space<vmem>>, vector<128x128xbf16>
    %cst = arith.constant dense<0.000000e+00> : vector<128x128xf32>
    %2 = tpu.matmul %1, %0, %cst {dimension_numbers = #tpu.dot_dimension_numbers<[1], [0], [0], [1], [0, 0, 1, 1], [], []>} : vector<128x128xbf16>, vector<128x128xbf16>, vector<128x128xf32> -> vector<128x128xf32>
    %c0_3 = arith.constant 0 : index
    %c0_4 = arith.constant 0 : index
    %3 = vector.load %arg3[%c0_3, %c0_4] : memref<128x1xf32, #tpu.memory_space<vmem>>, vector<128x1xf32>
    %4 = vector.broadcast %3 : vector<128x1xf32> to vector<128x128xf32>
    %5 = arith.addf %2, %4 : vector<128x128xf32>
    %cst_5 = arith.constant 0.000000e+00 : f32
    %6 = vector.broadcast %cst_5 : f32 to vector<128x128xf32>
    %7 = arith.maximumf %5, %6 : vector<128x128xf32>
    %c0_6 = arith.constant 0 : index
    %c0_7 = arith.constant 0 : index
    %8 = vector.load %arg4[%c0_6, %c0_7] : memref<512x128xbf16, #tpu.memory_space<vmem>>, vector<512x128xbf16>
    %9 = arith.truncf %7 : vector<128x128xf32> to vector<128x128xbf16>
    %cst_8 = arith.constant dense<0.000000e+00> : vector<512x128xf32>
    %10 = tpu.matmul %8, %9, %cst_8 {dimension_numbers = #tpu.dot_dimension_numbers<[1], [0], [0], [1], [0, 0, 1, 1], [], []>} : vector<512x128xbf16>, vector<128x128xbf16>, vector<512x128xf32> -> vector<512x128xf32>
    %c0_9 = arith.constant 0 : index
    %c0_10 = arith.constant 0 : index
    %11 = vector.load %arg5[%c0_9, %c0_10] : memref<512x1xf32, #tpu.memory_space<vmem>>, vector<512x1xf32>
    %12 = vector.broadcast %11 : vector<512x1xf32> to vector<512x128xf32>
    %13 = arith.addf %10, %12 : vector<512x128xf32>
    %cst_11 = arith.constant 0.000000e+00 : f32
    %14 = vector.broadcast %cst_11 : f32 to vector<512x128xf32>
    %15 = arith.maximumf %13, %14 : vector<512x128xf32>
    %c0_12 = arith.constant 0 : index
    %c0_13 = arith.constant 0 : index
    %16 = vector.load %arg6[%c0_12, %c0_13] : memref<128x512xbf16, #tpu.memory_space<vmem>>, vector<128x512xbf16>
    %17 = arith.truncf %15 : vector<512x128xf32> to vector<512x128xbf16>
    %cst_14 = arith.constant dense<0.000000e+00> : vector<128x128xf32>
    %18 = tpu.matmul %16, %17, %cst_14 {dimension_numbers = #tpu.dot_dimension_numbers<[1], [0], [0], [1], [0, 0, 1, 1], [], []>} : vector<128x512xbf16>, vector<512x128xbf16>, vector<128x128xf32> -> vector<128x128xf32>
    %c0_15 = arith.constant 0 : index
    %c0_16 = arith.constant 0 : index
    %19 = vector.load %arg7[%c0_15, %c0_16] : memref<128x1xf32, #tpu.memory_space<vmem>>, vector<128x1xf32>
    %20 = vector.broadcast %19 : vector<128x1xf32> to vector<128x128xf32>
    %21 = arith.addf %18, %20 : vector<128x128xf32>
    %cst_17 = arith.constant 0.000000e+00 : f32
    %22 = vector.broadcast %cst_17 : f32 to vector<128x128xf32>
    %23 = arith.maximumf %21, %22 : vector<128x128xf32>
    %c0_18 = arith.constant 0 : index
    %c0_19 = arith.constant 0 : index
    %24 = vector.load %arg8[%c0_18, %c0_19] : memref<512x128xbf16, #tpu.memory_space<vmem>>, vector<512x128xbf16>
    %25 = arith.truncf %23 : vector<128x128xf32> to vector<128x128xbf16>
    %cst_20 = arith.constant dense<0.000000e+00> : vector<512x128xf32>
    %26 = tpu.matmul %24, %25, %cst_20 {dimension_numbers = #tpu.dot_dimension_numbers<[1], [0], [0], [1], [0, 0, 1, 1], [], []>} : vector<512x128xbf16>, vector<128x128xbf16>, vector<512x128xf32> -> vector<512x128xf32>
    %c0_21 = arith.constant 0 : index
    %c0_22 = arith.constant 0 : index
    %27 = vector.load %arg9[%c0_21, %c0_22] : memref<512x1xf32, #tpu.memory_space<vmem>>, vector<512x1xf32>
    %28 = vector.broadcast %27 : vector<512x1xf32> to vector<512x128xf32>
    %29 = arith.addf %26, %28 : vector<512x128xf32>
    %cst_23 = arith.constant 0.000000e+00 : f32
    %30 = vector.broadcast %cst_23 : f32 to vector<512x128xf32>
    %31 = arith.maximumf %29, %30 : vector<512x128xf32>
    %c0_24 = arith.constant 0 : index
    %c0_25 = arith.constant 0 : index
    %32 = vector.load %arg10[%c0_24, %c0_25] : memref<8x512xbf16, #tpu.memory_space<vmem>>, vector<8x512xbf16>
    %33 = arith.truncf %31 : vector<512x128xf32> to vector<512x128xbf16>
    %cst_26 = arith.constant dense<0.000000e+00> : vector<8x128xf32>
    %34 = tpu.matmul %32, %33, %cst_26 {dimension_numbers = #tpu.dot_dimension_numbers<[1], [0], [0], [1], [0, 0, 1, 1], [], []>} : vector<8x512xbf16>, vector<512x128xbf16>, vector<8x128xf32> -> vector<8x128xf32>
    %c0_27 = arith.constant 0 : index
    %c0_28 = arith.constant 0 : index
    %35 = vector.load %arg11[%c0_27, %c0_28] : memref<8x1xf32, #tpu.memory_space<vmem>>, vector<8x1xf32>
    %36 = vector.broadcast %35 : vector<8x1xf32> to vector<8x128xf32>
    %37 = arith.addf %34, %36 : vector<8x128xf32>
    %38 = vector.extract_strided_slice %37 {offsets = [0, 0], sizes = [1, 128], strides = [1, 1]} : vector<8x128xf32> to vector<1x128xf32>
    %cst_29 = arith.constant 0.000000e+00 : f32
    %39 = vector.broadcast %cst_29 : f32 to vector<1x128xf32>
    %40 = arith.subf %39, %38 : vector<1x128xf32>
    %41 = math.exp %40 : vector<1x128xf32>
    %cst_30 = arith.constant 1.000000e+00 : f32
    %42 = vector.broadcast %cst_30 : f32 to vector<1x128xf32>
    %43 = arith.addf %42, %41 : vector<1x128xf32>
    %cst_31 = arith.constant 1.000000e+00 : f32
    %44 = vector.broadcast %cst_31 : f32 to vector<1x128xf32>
    %45 = arith.divf %44, %43 : vector<1x128xf32>
    %c0_32 = arith.constant 0 : index
    %c0_33 = arith.constant 0 : index
    %46 = vector.load %arg12[%c0_32, %c0_33] : memref<1x128xf32, #tpu.memory_space<vmem>>, vector<1x128xf32>
    tpu.vector_store %arg12[%c0_32, %c0_33], %45 {strides = array<i32>} : memref<1x128xf32, #tpu.memory_space<vmem>>, vector<1x128xf32>,
    return
  }
  func.func @transform_0(%arg0: i32) -> (i32, i32) {
    %c0_i32 = arith.constant 0 : i32
    %c0_i32_0 = arith.constant 0 : i32
    return %c0_i32, %arg0 : i32, i32
  }
  func.func @transform_1(%arg0: i32) -> (i32, i32) {
    %c0_i32 = arith.constant 0 : i32
    %c0_i32_0 = arith.constant 0 : i32
    %c0_i32_1 = arith.constant 0 : i32
    return %c0_i32, %c0_i32_0 : i32, i32
  }
  func.func @transform_2(%arg0: i32) -> (i32, i32) {
    %c0_i32 = arith.constant 0 : i32
    %c0_i32_0 = arith.constant 0 : i32
    %c0_i32_1 = arith.constant 0 : i32
    return %c0_i32, %c0_i32_0 : i32, i32
  }
  func.func @transform_3(%arg0: i32) -> (i32, i32) {
    %c0_i32 = arith.constant 0 : i32
    %c0_i32_0 = arith.constant 0 : i32
    %c0_i32_1 = arith.constant 0 : i32
    return %c0_i32, %c0_i32_0 : i32, i32
  }
  func.func @transform_4(%arg0: i32) -> (i32, i32) {
    %c0_i32 = arith.constant 0 : i32
    %c0_i32_0 = arith.constant 0 : i32
    %c0_i32_1 = arith.constant 0 : i32
    return %c0_i32, %c0_i32_0 : i32, i32
  }
  func.func @transform_5(%arg0: i32) -> (i32, i32) {
    %c0_i32 = arith.constant 0 : i32
    %c0_i32_0 = arith.constant 0 : i32
    %c0_i32_1 = arith.constant 0 : i32
    return %c0_i32, %c0_i32_0 : i32, i32
  }
  func.func @transform_6(%arg0: i32) -> (i32, i32) {
    %c0_i32 = arith.constant 0 : i32
    %c0_i32_0 = arith.constant 0 : i32
    %c0_i32_1 = arith.constant 0 : i32
    return %c0_i32, %c0_i32_0 : i32, i32
  }
  func.func @transform_7(%arg0: i32) -> (i32, i32) {
    %c0_i32 = arith.constant 0 : i32
    %c0_i32_0 = arith.constant 0 : i32
    %c0_i32_1 = arith.constant 0 : i32
    return %c0_i32, %c0_i32_0 : i32, i32
  }
  func.func @transform_8(%arg0: i32) -> (i32, i32) {
    %c0_i32 = arith.constant 0 : i32
    %c0_i32_0 = arith.constant 0 : i32
    %c0_i32_1 = arith.constant 0 : i32
    return %c0_i32, %c0_i32_0 : i32, i32
  }
  func.func @transform_9(%arg0: i32) -> (i32, i32) {
    %c0_i32 = arith.constant 0 : i32
    %c0_i32_0 = arith.constant 0 : i32
    %c0_i32_1 = arith.constant 0 : i32
    return %c0_i32, %c0_i32_0 : i32, i32
  }
  func.func @transform_10(%arg0: i32) -> (i32, i32) {
    %c0_i32 = arith.constant 0 : i32
    %c0_i32_0 = arith.constant 0 : i32
    %c0_i32_1 = arith.constant 0 : i32
    return %c0_i32, %c0_i32_0 : i32, i32
  }
  func.func @transform_11(%arg0: i32) -> (i32, i32) {
    %c0_i32 = arith.constant 0 : i32
    %c0_i32_0 = arith.constant 0 : i32
    return %c0_i32, %arg0 : i32, i32
  }
}

</mosaic_0001>

<bundles_post_ra>
// kernel: tpu_custom_call.1
= control target key start
LH: loop header
LB: loop body
LE: loop exit
PB: predicated region body
PF: predicated region fallthrough
CT: control target
= control target key end

     0   :  { %v3804_v2 = vmov 0   ;;  %s5198_s0 = inlined_call_operand.vmem [shape: bf16[128,128], index: 0, kind: input, shape index: {}]   ;;  %s5199_s1 = inlined_call_operand.vmem [shape: bf16[128,128], index: 1, kind: input, shape index: {}]   ;;  %s5200_s2 = inlined_call_operand.vmem [shape: f32[128,1], index: 2, kind: input, shape index: {}]   ;;  %s5201_s3 = inlined_call_operand.vmem [shape: bf16[512,128], index: 3, kind: input, shape index: {}]   ;;  %s5202_s4 = inlined_call_operand.vmem [shape: f32[512,1], index: 4, kind: input, shape index: {}]   ;;  %s5203_s5 = inlined_call_operand.vmem [shape: bf16[128,512], index: 5, kind: input, shape index: {}]   ;;  %s5204_s6 = inlined_call_operand.vmem [shape: f32[128,1], index: 6, kind: input, shape index: {}]   ;;  %s5205_s7 = inlined_call_operand.vmem [shape: bf16[512,128], index: 7, kind: input, shape index: {}]   ;;  %s5206_s8 = inlined_call_operand.vmem [shape: f32[512,1], index: 8, kind: input, shape index: {}]   ;;  %s5207_s9 = inlined_call_operand.vmem [shape: bf16[8,512], index: 9, kind: input, shape index: {}]   ;;  %s5208_s10 = inlined_call_operand.vmem [shape: f32[8,1], index: 10, kind: input, shape index: {}]   ;;  %s5209_s11 = inlined_call_operand.hbm [shape: f32[1,128], index: 11, kind: output, shape index: {}]  }
   0x1   :  { %v74_v0 = vld [vmem:[%s5200_s2 + $0x10] sm:$0xff]  ;;  %v72_v1 = vld [vmem:[%s5200_s2] sm:$0xff]  ;;  %3643 = vset.pattern.permute.xlu1 %v3804_v2  ;;  %3642 = vset.pattern.permute.xlu0 %v3804_v2  ;;  %v75_v4 = vld [vmem:[%s5200_s2 + $0x18] sm:$0xff] }
   0x2   :  { %v3644_v3 = vld [vmem:[%s5198_s0] sm:$0xff]   ;;  %100 = vperm.xlu1 %3643, %v74_v0   ;;  %90 = vperm.xlu0 %3642, %v72_v1   ;;  %v73_v5 = vld [vmem:[%s5200_s2 + $0x8] sm:$0xff]  ;;  %v3646_v7 = vld [vmem:[%s5198_s0 + $0x10] sm:$0xff]  }
   0x3   :  { %3448 = vmatprep.subr.bf16.mxu0 %v3644_v3  ;;  %v3645_v6 = vld [vmem:[%s5198_s0 + $0x8] sm:$0xff]   ;;  %v76_v9 = vld [vmem:[%s5200_s2 + $0x20] sm:$0xff]  ;;  %v3647_v10 = vld [vmem:[%s5198_s0 + $0x18] sm:$0xff]  }
   0x4   :  { %3449 = vmatpush3.bf16.msra.mxu0 %v3644_v3  ;;  %v77_v8 = vld [vmem:[%s5200_s2 + $0x28] sm:$0xff]  ;;  %v79_v11 = vld [vmem:[%s5200_s2 + $0x38] sm:$0xff]  ;;  %v78_v12 = vld [vmem:[%s5200_s2 + $0x30] sm:$0xff] }
   0x5   :  { %3450 = vmatprep.subr.bf16.mxu0 %v3645_v6  ;;  %v81_v13 = vld [vmem:[%s5200_s2 + $0x48] sm:$0xff]  ;;  %v3648_v14 = vld [vmem:[%s5198_s0 + $0x20] sm:$0xff]   ;;  %v83_v18 = vld [vmem:[%s5200_s2 + $0x58] sm:$0xff] }
   0x6   :  { %105 = vperm.xlu1 %3643, %v75_v4   ;;  %95 = vperm.xlu0 %3642, %v73_v5   ;;  %v3652_v15 = vld [vmem:[%s5199_s1] sm:$0xff]   ;;  %v3649_v17 = vld [vmem:[%s5198_s0 + $0x28] sm:$0xff]   ;;  %v82_v19 = vld [vmem:[%s5200_s2 + $0x50] sm:$0xff] }
   0x7   :  { %v80_v16 = vld [vmem:[%s5200_s2 + $0x40] sm:$0xff]  ;;  %3464 = vmatprep.mubr.bf16.mxu0 %v3652_v15  ;;  %v3650_v20 = vld [vmem:[%s5198_s0 + $0x30] sm:$0xff]   ;;  %v85_v21 = vld [vmem:[%s5200_s2 + $0x68] sm:$0xff] }
   0x8   :  { %3451 = vmatpush3.bf16.msra.mxu0 %v3645_v6  ;;  %v84_v22 = vld [vmem:[%s5200_s2 + $0x60] sm:$0xff]  ;;  %v3651_v23 = vld [vmem:[%s5198_s0 + $0x38] sm:$0xff]   ;;  %v86_v25 = vld [vmem:[%s5200_s2 + $0x70] sm:$0xff] }
   0x9   :  { %3452 = vmatprep.subr.bf16.mxu0 %v3646_v7  ;;  %v87_v24 = vld [vmem:[%s5200_s2 + $0x78] sm:$0xff]  ;;  %v466_v26 = vld [vmem:[%s5202_s4 + $0x88] sm:$0xff]  ;;  %v465_v27 = vld [vmem:[%s5202_s4 + $0x80] sm:$0xff] }
   0xa   :  { %115 = vperm.xlu1 %3643, %v77_v8   ;;  %110 = vperm.xlu0 %3642, %v76_v9   ;;  %v3653_v28 = vld [vmem:[%s5199_s1 + $0x8] sm:$0xff]   ;;  %v3654_v29 = vld [vmem:[%s5199_s1 + $0x10] sm:$0xff]   ;;  %v449_v31 = vld [vmem:[%s5202_s4] sm:$0xff] }
   0xb   :  { %v450_v30 = vld [vmem:[%s5202_s4 + $0x8] sm:$0xff]  ;;  %v468_v32 = vld [vmem:[%s5202_s4 + $0x98] sm:$0xff]  ;;  %v467_v33 = vld [vmem:[%s5202_s4 + $0x90] sm:$0xff] }
   0xc   :  { %3453 = vmatpush3.bf16.msra.mxu0 %v3646_v7  ;;  %v3655_v34 = vld [vmem:[%s5199_s1 + $0x18] sm:$0xff]   ;;  %v3656_v35 = vld [vmem:[%s5199_s1 + $0x20] sm:$0xff]   ;;  %v451_v37 = vld [vmem:[%s5202_s4 + $0x10] sm:$0xff] }
   0xd   :  { %3454 = vmatprep.subr.bf16.mxu0 %v3647_v10  ;;  %v452_v36 = vld [vmem:[%s5202_s4 + $0x18] sm:$0xff]  ;;  %v470_v38 = vld [vmem:[%s5202_s4 + $0xa8] sm:$0xff]  ;;  %v469_v39 = vld [vmem:[%s5202_s4 + $0xa0] sm:$0xff] }
   0xe   :  { %125 = vperm.xlu1 %3643, %v79_v11   ;;  %120 = vperm.xlu0 %3642, %v78_v12   ;;  %v3657_v40 = vld [vmem:[%s5199_s1 + $0x28] sm:$0xff]   ;;  %v3658_v41 = vld [vmem:[%s5199_s1 + $0x30] sm:$0xff]   ;;  %v453_v43 = vld [vmem:[%s5202_s4 + $0x20] sm:$0xff] }
   0xf   :  { %v454_v42 = vld [vmem:[%s5202_s4 + $0x28] sm:$0xff]  ;;  %v472_v44 = vld [vmem:[%s5202_s4 + $0xb8] sm:$0xff]  ;;  %v471_v45 = vld [vmem:[%s5202_s4 + $0xb0] sm:$0xff] }
  0x10   :  { %3455 = vmatpush3.bf16.msra.mxu0 %v3647_v10  ;;  %v3659_v46 = vld [vmem:[%s5199_s1 + $0x38] sm:$0xff]   ;;  %v455_v48 = vld [vmem:[%s5202_s4 + $0x30] sm:$0xff]  ;;  %v474_v49 = vld [vmem:[%s5202_s4 + $0xc8] sm:$0xff] }
  0x11   :  { %3456 = vmatprep.subr.bf16.mxu0 %v3648_v14  ;;  %v456_v47 = vld [vmem:[%s5202_s4 + $0x38] sm:$0xff]  ;;  %v473_v50 = vld [vmem:[%s5202_s4 + $0xc0] sm:$0xff]  ;;  %v458_v51 = vld [vmem:[%s5202_s4 + $0x48] sm:$0xff] }
  0x12   :  { %135 = vperm.xlu1 %3643, %v81_v13   ;;  %130 = vperm.xlu0 %3642, %v80_v16   ;;  %v457_v52 = vld [vmem:[%s5202_s4 + $0x40] sm:$0xff]  ;;  %v476_v53 = vld [vmem:[%s5202_s4 + $0xd8] sm:$0xff]  ;;  %v475_v54 = vld [vmem:[%s5202_s4 + $0xd0] sm:$0xff] }
  0x13   :  { %v460_v55 = vld [vmem:[%s5202_s4 + $0x58] sm:$0xff]  ;;  %v459_v56 = vld [vmem:[%s5202_s4 + $0x50] sm:$0xff]  ;;  %v478_v57 = vld [vmem:[%s5202_s4 + $0xe8] sm:$0xff] }
  0x14   :  { %3457 = vmatpush3.bf16.msra.mxu0 %v3648_v14  ;;  %v477_v58 = vld [vmem:[%s5202_s4 + $0xe0] sm:$0xff]  ;;  %v462_v59 = vld [vmem:[%s5202_s4 + $0x68] sm:$0xff]  ;;  %v480_v61 = vld [vmem:[%s5202_s4 + $0xf8] sm:$0xff] }
  0x15   :  { %3458 = vmatprep.subr.bf16.mxu0 %v3649_v17  ;;  %v461_v60 = vld [vmem:[%s5202_s4 + $0x60] sm:$0xff]  ;;  %v479_v62 = vld [vmem:[%s5202_s4 + $0xf0] sm:$0xff]  ;;  %v464_v63 = vld [vmem:[%s5202_s4 + $0x78] sm:$0xff] }
  0x16   :  { %145 = vperm.xlu1 %3643, %v83_v18   ;;  %140 = vperm.xlu0 %3642, %v82_v19   ;;  %v463_v0 = vld [vmem:[%s5202_s4 + $0x70] sm:$0xff]  ;;  %v498_v1 = vld [vmem:[%s5202_s4 + $0x188] sm:$0xff]  ;;  %v497_v2 = vld [vmem:[%s5202_s4 + $0x180] sm:$0xff] }
  0x17   :  { %v482_v3 = vld [vmem:[%s5202_s4 + $0x108] sm:$0xff]  ;;  %v481_v4 = vld [vmem:[%s5202_s4 + $0x100] sm:$0xff]  ;;  %v500_v5 = vld [vmem:[%s5202_s4 + $0x198] sm:$0xff] }
  0x18   :  { %3459 = vmatpush3.bf16.msra.mxu0 %v3649_v17  ;;  %v499_v6 = vld [vmem:[%s5202_s4 + $0x190] sm:$0xff]  ;;  %v484_v7 = vld [vmem:[%s5202_s4 + $0x118] sm:$0xff] }
  0x19   :  { %3460 = vmatprep.subr.bf16.mxu0 %v3650_v20  ;;  %v483_v8 = vld [vmem:[%s5202_s4 + $0x110] sm:$0xff] }
  0x1a   :  { %155 = vperm.xlu1 %3643, %v85_v21   ;;  %150 = vperm.xlu0 %3642, %v84_v22  }
  0x1c   :  { %3461 = vmatpush3.bf16.msra.mxu0 %v3650_v20 }
  0x1d   :  { %3462 = vmatprep.subr.bf16.mxu0 %v3651_v23 }
  0x1e   :  { %165 = vperm.xlu1 %3643, %v87_v24   ;;  %160 = vperm.xlu0 %3642, %v86_v25  }
  0x20   :  { %3463 = vmatpush3.bf16.msra.mxu0 %v3651_v23 }
  0x22   :  { %600 = vperm.xlu1 %3643, %v466_v26   ;;  %595 = vperm.xlu0 %3642, %v465_v27  }
  0x23   :  { %3465 = vmatmul.mubr.bf16.vlgmr.msra.gmra.mrb[0].mxu0 %v3653_v28 }
  0x24   :  { %3468 = vmatprep.mubr.bf16.mxu0 %v3654_v29 }
  0x26   :  { %520 = vperm.xlu1 %3643, %v450_v30   ;;  %515 = vperm.xlu0 %3642, %v449_v31  }
  0x2a   :  { %610 = vperm.xlu1 %3643, %v468_v32   ;;  %605 = vperm.xlu0 %3642, %v467_v33  }
  0x2b   :  { %3469 = vmatmul.mubr.bf16.gmra.mrb[4].mxu0 %v3655_v34 }
  0x2c   :  { %3472 = vmatprep.mubr.bf16.mxu0 %v3656_v35 }
  0x2e   :  { %530 = vperm.xlu1 %3643, %v452_v36   ;;  %525 = vperm.xlu0 %3642, %v451_v37  }
  0x32   :  { %620 = vperm.xlu1 %3643, %v470_v38   ;;  %615 = vperm.xlu0 %3642, %v469_v39  }
  0x33   :  { %3473 = vmatmul.mubr.bf16.gmra.mrb[8].mxu0 %v3657_v40 }
  0x34   :  { %3476 = vmatprep.mubr.bf16.mxu0 %v3658_v41 }
  0x36   :  { %540 = vperm.xlu1 %3643, %v454_v42   ;;  %535 = vperm.xlu0 %3642, %v453_v43  }
  0x3a   :  { %630 = vperm.xlu1 %3643, %v472_v44   ;;  %625 = vperm.xlu0 %3642, %v471_v45  }
  0x3b   :  { %3477 = vmatmul.mubr.bf16.gmra.mrb[12].mxu0 %v3659_v46 }
  0x3e   :  { %550 = vperm.xlu1 %3643, %v456_v47   ;;  %545 = vperm.xlu0 %3642, %v455_v48  }
  0x42   :  { %640 = vperm.xlu1 %3643, %v474_v49   ;;  %635 = vperm.xlu0 %3642, %v473_v50  }
  0x46   :  { %560 = vperm.xlu1 %3643, %v458_v51   ;;  %555 = vperm.xlu0 %3642, %v457_v52  }
  0x4a   :  { %650 = vperm.xlu1 %3643, %v476_v53   ;;  %645 = vperm.xlu0 %3642, %v475_v54  }
  0x4e   :  { %570 = vperm.xlu1 %3643, %v460_v55   ;;  %565 = vperm.xlu0 %3642, %v459_v56  }
  0x52   :  { %660 = vperm.xlu1 %3643, %v478_v57   ;;  %655 = vperm.xlu0 %3642, %v477_v58  }
  0x56   :  { %580 = vperm.xlu1 %3643, %v462_v59   ;;  %575 = vperm.xlu0 %3642, %v461_v60  }
  0x5a   :  { %670 = vperm.xlu1 %3643, %v480_v61   ;;  %665 = vperm.xlu0 %3642, %v479_v62  }
  0x5e   :  { %590 = vperm.xlu1 %3643, %v464_v63   ;;  %585 = vperm.xlu0 %3642, %v463_v0  }
  0x62   :  { %760 = vperm.xlu1 %3643, %v498_v1   ;;  %755 = vperm.xlu0 %3642, %v497_v2  }
  0x66   :  { %680 = vperm.xlu1 %3643, %v482_v3   ;;  %675 = vperm.xlu0 %3642, %v481_v4  }
  0x6a   :  { %770 = vperm.xlu1 %3643, %v500_v5   ;;  %765 = vperm.xlu0 %3642, %v499_v6  }
  0x6b   :  { %16 = vsyncpa [#allocation3], 0  ;;  %v502_v9 = vld [vmem:[%s5202_s4 + $0x1a8] sm:$0xff]  ;;  %v501_v10 = vld [vmem:[%s5202_s4 + $0x1a0] sm:$0xff] }
  0x6c   :  { %v486_v11 = vld [vmem:[%s5202_s4 + $0x128] sm:$0xff]  ;;  %v485_v12 = vld [vmem:[%s5202_s4 + $0x120] sm:$0xff]  ;;  %v504_v13 = vld [vmem:[%s5202_s4 + $0x1b8] sm:$0xff] }
  0x6d   :  { %v503_v14 = vld [vmem:[%s5202_s4 + $0x1b0] sm:$0xff]  ;;  %v488_v15 = vld [vmem:[%s5202_s4 + $0x138] sm:$0xff]  ;;  %v506_v17 = vld [vmem:[%s5202_s4 + $0x1c8] sm:$0xff] }
  0x6e   :  { %690 = vperm.xlu1 %3643, %v484_v7   ;;  %685 = vperm.xlu0 %3642, %v483_v8   ;;  %v487_v16 = vld [vmem:[%s5202_s4 + $0x130] sm:$0xff]  ;;  %v505_v18 = vld [vmem:[%s5202_s4 + $0x1c0] sm:$0xff]  ;;  %v490_v19 = vld [vmem:[%s5202_s4 + $0x148] sm:$0xff] }
  0x6f   :  { %v489_v20 = vld [vmem:[%s5202_s4 + $0x140] sm:$0xff]  ;;  %v508_v21 = vld [vmem:[%s5202_s4 + $0x1d8] sm:$0xff]  ;;  %v507_v22 = vld [vmem:[%s5202_s4 + $0x1d0] sm:$0xff] }
  0x70   :  { %v492_v25 = vld [vmem:[%s5202_s4 + $0x158] sm:$0xff]  ;;  %v491_v26 = vld [vmem:[%s5202_s4 + $0x150] sm:$0xff]  ;;  %v510_v28 = vld [vmem:[%s5202_s4 + $0x1e8] sm:$0xff] }
  0x71   :  { %v509_v29 = vld [vmem:[%s5202_s4 + $0x1e0] sm:$0xff]  ;;  %v494_v31 = vld [vmem:[%s5202_s4 + $0x168] sm:$0xff]  ;;  %v512_v35 = vld [vmem:[%s5202_s4 + $0x1f8] sm:$0xff] }
  0x72   :  { %780 = vperm.xlu1 %3643, %v502_v9   ;;  %775 = vperm.xlu0 %3642, %v501_v10   ;;  %v493_v32 = vld [vmem:[%s5202_s4 + $0x160] sm:$0xff]  ;;  %v511_v36 = vld [vmem:[%s5202_s4 + $0x1f0] sm:$0xff]  ;;  %v496_v38 = vld [vmem:[%s5202_s4 + $0x178] sm:$0xff] }
  0x73   :  { %v495_v39 = vld [vmem:[%s5202_s4 + $0x170] sm:$0xff]  ;;  %v3660_v41 = vld [vmem:[%s5201_s3] sm:$0xff]   ;;  %v1443_v42 = vld [vmem:[%s5204_s6 + $0x8] sm:$0xff] }
  0x74   :  { %v1442_v43 = vld [vmem:[%s5204_s6] sm:$0xff]  ;;  %3496 = vmatprep.mubr.bf16.mxu1 %v3660_v41  ;;  %v1445_v46 = vld [vmem:[%s5204_s6 + $0x18] sm:$0xff]  ;;  %v1444_v47 = vld [vmem:[%s5204_s6 + $0x10] sm:$0xff] }
  0x75   :  { %v1447_v49 = vld [vmem:[%s5204_s6 + $0x28] sm:$0xff]  ;;  %v1446_v50 = vld [vmem:[%s5204_s6 + $0x20] sm:$0xff]  ;;  %v1449_v52 = vld [vmem:[%s5204_s6 + $0x38] sm:$0xff] }
  0x76   :  { %700 = vperm.xlu1 %3643, %v486_v11   ;;  %695 = vperm.xlu0 %3642, %v485_v12   ;;  %v1448_v53 = vld [vmem:[%s5204_s6 + $0x30] sm:$0xff]  ;;  %v1451_v56 = vld [vmem:[%s5204_s6 + $0x48] sm:$0xff]  ;;  %v1450_v57 = vld [vmem:[%s5204_s6 + $0x40] sm:$0xff] }
  0x77   :  { %v1453_v59 = vld [vmem:[%s5204_s6 + $0x58] sm:$0xff]  ;;  %v1452_v60 = vld [vmem:[%s5204_s6 + $0x50] sm:$0xff]  ;;  %v1455_v62 = vld [vmem:[%s5204_s6 + $0x68] sm:$0xff] }
  0x78   :  { %v1454_v63 = vld [vmem:[%s5204_s6 + $0x60] sm:$0xff]  ;;  %v1457_v2 = vld [vmem:[%s5204_s6 + $0x78] sm:$0xff]  ;;  %v1456_v3 = vld [vmem:[%s5204_s6 + $0x70] sm:$0xff] }
  0x79   :  { %v1997_v5 = vld [vmem:[%s5206_s8 + $0x88] sm:$0xff]  ;;  %v1996_v6 = vld [vmem:[%s5206_s8 + $0x80] sm:$0xff]  ;;  %v1999_v12 = vld [vmem:[%s5206_s8 + $0x98] sm:$0xff] }
  0x7a   :  { %790 = vperm.xlu1 %3643, %v504_v13   ;;  %785 = vperm.xlu0 %3642, %v503_v14   ;;  %v1981_v8 = vld [vmem:[%s5206_s8 + $0x8] sm:$0xff]  ;;  %v1980_v9 = vld [vmem:[%s5206_s8] sm:$0xff]  ;;  %v1998_v13 = vld [vmem:[%s5206_s8 + $0x90] sm:$0xff] }
  0x7b   :  { %v2004_v41 = vld [vmem:[%s5206_s8 + $0xc0] sm:$0xff] }
  0x7e   :  { %710 = vperm.xlu1 %3643, %v488_v15   ;;  %705 = vperm.xlu0 %3642, %v487_v16   ;;  %v1983_v15 = vld [vmem:[%s5206_s8 + $0x18] sm:$0xff]  ;;  %v1982_v16 = vld [vmem:[%s5206_s8 + $0x10] sm:$0xff] }
  0x81   :  { %v4124_v23 = vpop.permute.xlu0 %90  ;;  %v4126_v24 = vpop.permute.xlu1 %100 }
  0x82   :  { %800 = vperm.xlu1 %3643, %v506_v17   ;;  %795 = vperm.xlu0 %3642, %v505_v18   ;;  %v2001_v18 = vld [vmem:[%s5206_s8 + $0xa8] sm:$0xff] }
  0x85   :  { %v4134_v27 = vpop.permute.xlu0 %95  ;;  %v4142_v30 = vpop.permute.xlu1 %105 }
  0x86   :  { %720 = vperm.xlu1 %3643, %v490_v19   ;;  %715 = vperm.xlu0 %3642, %v489_v20   ;;  %v2000_v19 = vld [vmem:[%s5206_s8 + $0xa0] sm:$0xff] }
  0x89   :  { %v4150_v33 = vpop.permute.xlu0 %110  ;;  %v4152_v34 = vpop.permute.xlu1 %115 }
  0x8a   :  { %810 = vperm.xlu1 %3643, %v508_v21   ;;  %805 = vperm.xlu0 %3642, %v507_v22   ;;  %v1985_v22 = vld [vmem:[%s5206_s8 + $0x28] sm:$0xff] }
  0x8d   :  { %v4160_v37 = vpop.permute.xlu0 %120  ;;  %v4168_v40 = vpop.permute.xlu1 %125 }
  0x8e   :  { %730 = vperm.xlu1 %3643, %v492_v25   ;;  %725 = vperm.xlu0 %3642, %v491_v26   ;;  %v1984_v25 = vld [vmem:[%s5206_s8 + $0x20] sm:$0xff] }
  0x91   :  { %v4179_v44 = vpop.permute.xlu0 %130  ;;  %v4181_v45 = vpop.permute.xlu1 %135 }
  0x92   :  { %820 = vperm.xlu1 %3643, %v510_v28   ;;  %815 = vperm.xlu0 %3642, %v509_v29   ;;  %v2003_v28 = vld [vmem:[%s5206_s8 + $0xb8] sm:$0xff]  ;;  %v2002_v29 = vld [vmem:[%s5206_s8 + $0xb0] sm:$0xff] }
  0x95   :  { %v4189_v48 = vpop.permute.xlu0 %140  ;;  %v4197_v51 = vpop.permute.xlu1 %145 }
  0x96   :  { %740 = vperm.xlu1 %3643, %v494_v31   ;;  %735 = vperm.xlu0 %3642, %v493_v32   ;;  %v1987_v32 = vld [vmem:[%s5206_s8 + $0x38] sm:$0xff] }
  0x99   :  { %v4205_v54 = vpop.permute.xlu0 %150  ;;  %v4207_v55 = vpop.permute.xlu1 %155 }
  0x9a   :  { %830 = vperm.xlu1 %3643, %v512_v35   ;;  %825 = vperm.xlu0 %3642, %v511_v36   ;;  %v1986_v35 = vld [vmem:[%s5206_s8 + $0x30] sm:$0xff] }
  0x9d   :  { %v4215_v58 = vpop.permute.xlu0 %160  ;;  %v4223_v61 = vpop.permute.xlu1 %165 }
  0x9e   :  { %750 = vperm.xlu1 %3643, %v496_v38   ;;  %745 = vperm.xlu0 %3642, %v495_v39   ;;  %v2005_v39 = vld [vmem:[%s5206_s8 + $0xc8] sm:$0xff] }
  0xa1   :  { %v4231_v0 = vpop.permute.xlu0 %595  ;;  %v4233_v1 = vpop.permute.xlu1 %600 }
  0xa2   :  { %1465 = vperm.xlu1 %3643, %v1443_v42   ;;  %1460 = vperm.xlu0 %3642, %v1442_v43   ;;  %v1989_v43 = vld [vmem:[%s5206_s8 + $0x48] sm:$0xff] }
  0xa5   :  { %v4241_v4 = vpop.permute.xlu0 %515  ;;  %v4249_v7 = vpop.permute.xlu1 %520 }
  0xa6   :  { %1475 = vperm.xlu1 %3643, %v1445_v46   ;;  %1470 = vperm.xlu0 %3642, %v1444_v47   ;;  %v1988_v46 = vld [vmem:[%s5206_s8 + $0x40] sm:$0xff] }
  0xa9   :  { %v4257_v10 = vpop.permute.xlu0 %605  ;;  %v4259_v11 = vpop.permute.xlu1 %610 }
  0xaa   :  { %1485 = vperm.xlu1 %3643, %v1447_v49   ;;  %1480 = vperm.xlu0 %3642, %v1446_v50   ;;  %v2007_v49 = vld [vmem:[%s5206_s8 + $0xd8] sm:$0xff]  ;;  %v2006_v50 = vld [vmem:[%s5206_s8 + $0xd0] sm:$0xff] }
  0xad   :  { %v4267_v14 = vpop.permute.xlu0 %525  ;;  %v4275_v17 = vpop.permute.xlu1 %530 }
  0xae   :  { %1495 = vperm.xlu1 %3643, %v1449_v52   ;;  %1490 = vperm.xlu0 %3642, %v1448_v53  }
  0xb1   :  { %v4283_v20 = vpop.permute.xlu0 %615  ;;  %v4285_v21 = vpop.permute.xlu1 %620 }
  0xb2   :  { %1505 = vperm.xlu1 %3643, %v1451_v56   ;;  %1500 = vperm.xlu0 %3642, %v1450_v57   ;;  %v1991_v56 = vld [vmem:[%s5206_s8 + $0x58] sm:$0xff]  ;;  %v1990_v57 = vld [vmem:[%s5206_s8 + $0x50] sm:$0xff] }
  0xb5   :  { %v4293_v26 = vpop.permute.xlu0 %535  ;;  %v4301_v31 = vpop.permute.xlu1 %540 }
  0xb6   :  { %1515 = vperm.xlu1 %3643, %v1453_v59   ;;  %1510 = vperm.xlu0 %3642, %v1452_v60   ;;  %v2009_v60 = vld [vmem:[%s5206_s8 + $0xe8] sm:$0xff] }
  0xb9   :  { %v4309_v36 = vpop.permute.xlu0 %625  ;;  %v4311_v38 = vpop.permute.xlu1 %630 }
  0xba   :  { %1525 = vperm.xlu1 %3643, %v1455_v62   ;;  %1520 = vperm.xlu0 %3642, %v1454_v63   ;;  %v2008_v62 = vld [vmem:[%s5206_s8 + $0xe0] sm:$0xff] }
  0xbd   :  { %v4319_v42 = vpop.permute.xlu0 %545  ;;  %v4327_v47 = vpop.permute.xlu1 %550 }
  0xbe   :  { %1535 = vperm.xlu1 %3643, %v1457_v2   ;;  %1530 = vperm.xlu0 %3642, %v1456_v3   ;;  %v1993_v2 = vld [vmem:[%s5206_s8 + $0x68] sm:$0xff]  ;;  %v1992_v3 = vld [vmem:[%s5206_s8 + $0x60] sm:$0xff] }
  0xc1   :  { %v4335_v52 = vpop.permute.xlu0 %635  ;;  %v4337_v53 = vpop.permute.xlu1 %640 }
  0xc2   :  { %2131 = vperm.xlu1 %3643, %v1997_v5   ;;  %2126 = vperm.xlu0 %3642, %v1996_v6  }
  0xc5   :  { %v4345_v59 = vpop.permute.xlu0 %555  ;;  %v4353_v63 = vpop.permute.xlu1 %560 }
  0xc6   :  { %2051 = vperm.xlu1 %3643, %v1981_v8   ;;  %2046 = vperm.xlu0 %3642, %v1980_v9  }
  0xc9   :  { %v4361_v5 = vpop.permute.xlu0 %645  ;;  %v4363_v6 = vpop.permute.xlu1 %650 }
  0xca   :  { %2141 = vperm.xlu1 %3643, %v1999_v12   ;;  %2136 = vperm.xlu0 %3642, %v1998_v13   ;;  %v2011_v13 = vld [vmem:[%s5206_s8 + $0xf8] sm:$0xff] }
  0xce   :  { %2061 = vperm.xlu1 %3643, %v1983_v15   ;;  %2056 = vperm.xlu0 %3642, %v1982_v16   ;;  %v2010_v15 = vld [vmem:[%s5206_s8 + $0xf0] sm:$0xff] }
  0xd2   :  { %2151 = vperm.xlu1 %3643, %v2001_v18   ;;  %2146 = vperm.xlu0 %3642, %v2000_v19  }
  0xd6   :  { %2071 = vperm.xlu1 %3643, %v1985_v22   ;;  %2066 = vperm.xlu0 %3642, %v1984_v25   ;;  %v4374_v25 = vpop.permute.xlu0 %565 }
  0xda   :  { %2161 = vperm.xlu1 %3643, %v2003_v28   ;;  %2156 = vperm.xlu0 %3642, %v2002_v29  }
  0xde   :  { %2081 = vperm.xlu1 %3643, %v1987_v32   ;;  %2076 = vperm.xlu0 %3642, %v1986_v35   ;;  %v1995_v32 = vld [vmem:[%s5206_s8 + $0x78] sm:$0xff]  ;;  %v1994_v35 = vld [vmem:[%s5206_s8 + $0x70] sm:$0xff] }
  0xe2   :  { %2171 = vperm.xlu1 %3643, %v2005_v39   ;;  %2166 = vperm.xlu0 %3642, %v2004_v41  }
  0xe6   :  { %2091 = vperm.xlu1 %3643, %v1989_v43   ;;  %2086 = vperm.xlu0 %3642, %v1988_v46  }
  0xea   :  { %2181 = vperm.xlu1 %3643, %v2007_v49   ;;  %2176 = vperm.xlu0 %3642, %v2006_v50   ;;  %v2029_v50 = vld [vmem:[%s5206_s8 + $0x188] sm:$0xff] }
  0xee   :  { %2101 = vperm.xlu1 %3643, %v1991_v56   ;;  %2096 = vperm.xlu0 %3642, %v1990_v57   ;;  %v2028_v57 = vld [vmem:[%s5206_s8 + $0x180] sm:$0xff] }
  0xf2   :  { %2191 = vperm.xlu1 %3643, %v2009_v60   ;;  %2186 = vperm.xlu0 %3642, %v2008_v62   ;;  %v4392_v60 = vpop.permute.xlu0 %655 }
  0xf6   :  { %2111 = vperm.xlu1 %3643, %v1993_v2   ;;  %2106 = vperm.xlu0 %3642, %v1992_v3   ;;  %v3466_v8 = vpop.f32.mrb[0].mxu0 }
  0xf7   :  { %v307_v9 = vadd.f32 %v3466_v8, %v4126_v24  ;;  %v298_v12 = vpop.f32.mrb[1].mxu0 }
  0xf8   :  { %v3467_v16 = vpop.f32.mrb[2].mxu0  ;;  %v299_v18 = vadd.f32 %v298_v12, %v4124_v23  ;;  %v4383_v23 = vpop.permute.xlu1 %570 }
  0xf9   :  { %v310_v19 = vadd.f32 %v3467_v16, %v4142_v30  ;;  %v301_v22 = vpop.f32.mrb[3].mxu0  ;;  %v363_v24 = vmax.f32 %v307_v9, 0.0 }
  0xfa   :  { %2201 = vperm.xlu1 %3643, %v2011_v13   ;;  %2196 = vperm.xlu0 %3642, %v2010_v15   ;;  %v302_v29 = vadd.f32 %v301_v22, %v4134_v27  ;;  %v361_v30 = vmax.f32 %v299_v18, 0.0  ;;  %v2013_v13 = vld [vmem:[%s5206_s8 + $0x108] sm:$0xff] }
  0xfb   :  { %v364_v28 = vmax.f32 %v310_v19, 0.0  ;;  %v4405_v19 = vpop.permute.xlu0 %575 }
  0xfc   :  { %v362_v41 = vmax.f32 %v302_v29, 0.0  ;;  %v4396_v3 = vpop.permute.xlu1 %660 }
  0xfd   :  { %v442_v39 = vpack.c.bf16 %v364_v28, %v363_v24  ;;  %v2031_v28 = vld [vmem:[%s5206_s8 + $0x198] sm:$0xff] }
  0xfe   :  { %2121 = vperm.xlu1 %3643, %v1995_v32   ;;  %2116 = vperm.xlu0 %3642, %v1994_v35   ;;  %v3470_v43 = vpop.f32.mrb[4].mxu0  ;;  %v441_v27 = vpack.c.bf16 %v362_v41, %v361_v30  ;;  %v2030_v35 = vld [vmem:[%s5206_s8 + $0x190] sm:$0xff] }
  0xff   :  { %v323_v46 = vadd.f32 %v3470_v43, %v4160_v37  ;;  %v314_v49 = vpop.f32.mrb[5].mxu0 }
 0x100   :  { %v3471_v56 = vpop.f32.mrb[6].mxu0  ;;  %v315_v62 = vadd.f32 %v314_v49, %v4150_v33  ;;  %3480 = vmatprep.subr.bf16.mxu1 %v441_v27  ;;  %v2012_v33 = vld [vmem:[%s5206_s8 + $0x100] sm:$0xff]  ;;  %v4411_v29 = vpop.permute.xlu1 %580  ;;  %v2015_v49 = vld [vmem:[%s5206_s8 + $0x118] sm:$0xff] }
 0x101   :  { %v326_v2 = vadd.f32 %v3471_v56, %v4168_v40  ;;  %v317_v37 = vpop.f32.mrb[7].mxu0  ;;  %3481 = vmatpush3.bf16.msra.mxu1 %v441_v27  ;;  %v367_v8 = vmax.f32 %v323_v46, 0.0  ;;  %v4425_v27 = vpop.permute.xlu0 %665 }
 0x102   :  { %2291 = vperm.xlu1 %3643, %v2029_v50   ;;  %v318_v12 = vadd.f32 %v317_v37, %v4152_v34  ;;  %2286 = vperm.xlu0 %3642, %v2028_v57   ;;  %v365_v40 = vmax.f32 %v315_v62, 0.0 }
 0x103   :  { %v368_v9 = vmax.f32 %v326_v2, 0.0  ;;  %3482 = vmatprep.subr.bf16.mxu1 %v442_v39 }
 0x104   :  { %v366_v16 = vmax.f32 %v318_v12, 0.0  ;;  %v4427_v57 = vpop.permute.xlu1 %670  ;;  %v2032_v12 = vld [vmem:[%s5206_s8 + $0x1a0] sm:$0xff] }
 0x105   :  { %v444_v15 = vpack.c.bf16 %v368_v9, %v367_v8  ;;  %3483 = vmatpush3.bf16.msra.mxu1 %v442_v39  ;;  %v2033_v8 = vld [vmem:[%s5206_s8 + $0x1a8] sm:$0xff] }
 0x106   :  { %2211 = vperm.xlu1 %3643, %v2013_v13   ;;  %v3474_v18 = vpop.f32.mrb[8].mxu0  ;;  %v443_v22 = vpack.c.bf16 %v366_v16, %v365_v40  ;;  %2206 = vperm.xlu0 %3642, %v2012_v33  }
 0x107   :  { %v339_v34 = vadd.f32 %v3474_v18, %v4189_v48  ;;  %v330_v24 = vpop.f32.mrb[9].mxu0 }
 0x108   :  { %v3475_v32 = vpop.f32.mrb[10].mxu0  ;;  %v331_v30 = vadd.f32 %v330_v24, %v4179_v44  ;;  %3484 = vmatprep.subr.bf16.mxu1 %v443_v22  ;;  %v2014_v44 = vld [vmem:[%s5206_s8 + $0x110] sm:$0xff] }
 0x109   :  { %v342_v39 = vadd.f32 %v3475_v32, %v4197_v51  ;;  %v333_v41 = vpop.f32.mrb[11].mxu0  ;;  %3485 = vmatpush3.bf16.msra.mxu1 %v443_v22  ;;  %v371_v48 = vmax.f32 %v339_v34, 0.0  ;;  %v2017_v22 = vld [vmem:[%s5206_s8 + $0x128] sm:$0xff]  ;;  %v4444_v34 = vpop.permute.xlu1 %590 }
 0x10a   :  { %2301 = vperm.xlu1 %3643, %v2031_v28   ;;  %v334_v46 = vadd.f32 %v333_v41, %v4181_v45  ;;  %2296 = vperm.xlu0 %3642, %v2030_v35   ;;  %v369_v51 = vmax.f32 %v331_v30, 0.0  ;;  %v2034_v35 = vld [vmem:[%s5206_s8 + $0x1b0] sm:$0xff]  ;;  %v2019_v41 = vld [vmem:[%s5206_s8 + $0x138] sm:$0xff] }
 0x10b   :  { %v372_v43 = vmax.f32 %v342_v39, 0.0  ;;  %3486 = vmatprep.subr.bf16.mxu1 %v444_v15 }
 0x10c   :  { %v370_v56 = vmax.f32 %v334_v46, 0.0  ;;  %v3662_v46 = vld [vmem:[%s5201_s3 + $0x10] sm:$0xff]  }
 0x10d   :  { %v446_v50 = vpack.c.bf16 %v372_v43, %v371_v48  ;;  %3487 = vmatpush3.bf16.msra.mxu1 %v444_v15  ;;  %v4438_v15 = vpop.permute.xlu0 %585  ;;  %v4457_v39 = vpop.permute.xlu1 %760  ;;  %v2018_v48 = vld [vmem:[%s5206_s8 + $0x130] sm:$0xff]  ;;  %v3661_v43 = vld [vmem:[%s5201_s3 + $0x8] sm:$0xff]  }
 0x10e   :  { %2221 = vperm.xlu1 %3643, %v2015_v49   ;;  %v3478_v45 = vpop.f32.mrb[12].mxu0  ;;  %v445_v62 = vpack.c.bf16 %v370_v56, %v369_v51  ;;  %2216 = vperm.xlu0 %3642, %v2014_v44   ;;  %v2037_v44 = vld [vmem:[%s5206_s8 + $0x1c8] sm:$0xff] }
 0x10f   :  { %v355_v2 = vadd.f32 %v3478_v45, %v4215_v58  ;;  %v346_v37 = vpop.f32.mrb[13].mxu0  ;;  %v2021_v56 = vld [vmem:[%s5206_s8 + $0x148] sm:$0xff]  ;;  %v2020_v45 = vld [vmem:[%s5206_s8 + $0x140] sm:$0xff] }
 0x110   :  { %v3479_v9 = vpop.f32.mrb[14].mxu0  ;;  %v347_v13 = vadd.f32 %v346_v37, %v4205_v54  ;;  %3488 = vmatprep.subr.bf16.mxu1 %v445_v62  ;;  %v2016_v54 = vld [vmem:[%s5206_s8 + $0x120] sm:$0xff] }
 0x111   :  { %v358_v33 = vadd.f32 %v3479_v9, %v4223_v61  ;;  %v349_v40 = vpop.f32.mrb[15].mxu0  ;;  %3489 = vmatpush3.bf16.msra.mxu1 %v445_v62  ;;  %v375_v58 = vmax.f32 %v355_v2, 0.0  ;;  %v4455_v30 = vpop.permute.xlu0 %755  ;;  %v3663_v2 = vld [vmem:[%s5201_s3 + $0x18] sm:$0xff]  }
 0x112   :  { %2311 = vperm.xlu1 %3643, %v2033_v8   ;;  %v350_v18 = vadd.f32 %v349_v40, %v4207_v55  ;;  %2306 = vperm.xlu0 %3642, %v2032_v12   ;;  %v373_v61 = vmax.f32 %v347_v13, 0.0  ;;  %v2035_v55 = vld [vmem:[%s5206_s8 + $0x1b8] sm:$0xff]  ;;  %v4476_v51 = vpop.permute.xlu1 %680  ;;  %v3664_v8 = vld [vmem:[%s5201_s3 + $0x20] sm:$0xff]   ;;  %v2038_v12 = vld [vmem:[%s5206_s8 + $0x1d0] sm:$0xff] }
 0x113   :  { %v376_v16 = vmax.f32 %v358_v33, 0.0  ;;  %3490 = vmatprep.subr.bf16.mxu1 %v446_v50  ;;  %v2039_v9 = vld [vmem:[%s5206_s8 + $0x1d8] sm:$0xff] }
 0x114   :  { %v374_v28 = vmax.f32 %v350_v18, 0.0  ;;  %v2023_v33 = vld [vmem:[%s5206_s8 + $0x158] sm:$0xff]  ;;  %v3666_v18 = vld [vmem:[%s5201_s3 + $0x30] sm:$0xff]  }
 0x115   :  { %v448_v24 = vpack.c.bf16 %v376_v16, %v375_v58  ;;  %3491 = vmatpush3.bf16.msra.mxu1 %v446_v50  ;;  %v4471_v49 = vpop.permute.xlu0 %675  ;;  %v2036_v50 = vld [vmem:[%s5206_s8 + $0x1c0] sm:$0xff]  ;;  %v2022_v58 = vld [vmem:[%s5206_s8 + $0x150] sm:$0xff]  ;;  %v3665_v16 = vld [vmem:[%s5201_s3 + $0x28] sm:$0xff]  }
 0x116   :  { %2231 = vperm.xlu1 %3643, %v2017_v22   ;;  %v447_v32 = vpack.c.bf16 %v374_v28, %v373_v61  ;;  %2226 = vperm.xlu0 %3642, %v2016_v54   ;;  %v4492_v37 = vpop.permute.xlu1 %770  ;;  %v2041_v22 = vld [vmem:[%s5206_s8 + $0x1e8] sm:$0xff]  ;;  %v2040_v54 = vld [vmem:[%s5206_s8 + $0x1e0] sm:$0xff] }
 0x117   :  { %v2025_v28 = vld [vmem:[%s5206_s8 + $0x168] sm:$0xff] }
 0x118   :  { %3492 = vmatprep.subr.bf16.mxu1 %v447_v32 }
 0x119   :  { %3493 = vmatpush3.bf16.msra.mxu1 %v447_v32  ;;  %v4487_v62 = vpop.permute.xlu0 %765  ;;  %v2024_v32 = vld [vmem:[%s5206_s8 + $0x160] sm:$0xff] }
 0x11a   :  { %2321 = vperm.xlu1 %3643, %v2035_v55   ;;  %2316 = vperm.xlu0 %3642, %v2034_v35   ;;  %v4508_v40 = vpop.permute.xlu1 %690  ;;  %v3667_v55 = vld [vmem:[%s5201_s3 + $0x38] sm:$0xff]   ;;  %v3668_v35 = vld [vmem:[%s5201_s3 + $0x40] sm:$0xff]  }
 0x11b   :  { %3494 = vmatprep.subr.bf16.mxu1 %v448_v24 }
 0x11d   :  { %3495 = vmatpush3.bf16.msra.mxu1 %v448_v24  ;;  %v4503_v13 = vpop.permute.xlu0 %685 }
 0x11e   :  { %2241 = vperm.xlu1 %3643, %v2019_v41   ;;  %2236 = vperm.xlu0 %3642, %v2018_v48   ;;  %v4527_v24 = vpop.permute.xlu1 %780  ;;  %v2043_v48 = vld [vmem:[%s5206_s8 + $0x1f8] sm:$0xff] }
 0x120   :  { %3497 = vmatmul.mubr.bf16.vlgmr.msra.gmra.mrb[0].mxu1 %v3661_v43 }
 0x121   :  { %3500 = vmatprep.mubr.bf16.mxu1 %v3662_v46  ;;  %v4525_v61 = vpop.permute.xlu0 %775  ;;  %v2042_v46 = vld [vmem:[%s5206_s8 + $0x1f0] sm:$0xff] }
 0x122   :  { %2331 = vperm.xlu1 %3643, %v2037_v44   ;;  %2326 = vperm.xlu0 %3642, %v2036_v50   ;;  %v4546_v43 = vpop.permute.xlu1 %700  ;;  %v2027_v44 = vld [vmem:[%s5206_s8 + $0x178] sm:$0xff]  ;;  %v2026_v50 = vld [vmem:[%s5206_s8 + $0x170] sm:$0xff] }
 0x125   :  { %v4541_v41 = vpop.permute.xlu0 %695 }
 0x126   :  { %2251 = vperm.xlu1 %3643, %v2021_v56   ;;  %2246 = vperm.xlu0 %3642, %v2020_v45   ;;  %v3669_v45 = vld [vmem:[%s5201_s3 + $0x48] sm:$0xff]  }
 0x128   :  { %3501 = vmatmul.mubr.bf16.gmra.mrb[4].mxu1 %v3663_v2  ;;  %v4562_v2 = vpop.permute.xlu1 %790 }
 0x129   :  { %3504 = vmatprep.mubr.bf16.mxu1 %v3664_v8  ;;  %v4557_v56 = vpop.permute.xlu0 %785  ;;  %v3670_v8 = vld [vmem:[%s5201_s3 + $0x50] sm:$0xff]  }
 0x12a   :  { %2341 = vperm.xlu1 %3643, %v2039_v9   ;;  %2336 = vperm.xlu0 %3642, %v2038_v12   ;;  %v2943_v9 = vld [vmem:[%s5208_s10] sm:$0xff] }
 0x12d   :  { %v4570_v12 = vpop.permute.xlu0 %705 }
 0x12e   :  { %2261 = vperm.xlu1 %3643, %v2023_v33   ;;  %2256 = vperm.xlu0 %3642, %v2022_v58   ;;  %v3671_v33 = vld [vmem:[%s5201_s3 + $0x58] sm:$0xff]   ;;  %v3672_v58 = vld [vmem:[%s5201_s3 + $0x60] sm:$0xff]  }
 0x130   :  { %3505 = vmatmul.mubr.bf16.gmra.mrb[8].mxu1 %v3665_v16  ;;  %v3673_v16 = vld [vmem:[%s5201_s3 + $0x68] sm:$0xff]  }
 0x131   :  { %3508 = vmatprep.mubr.bf16.mxu1 %v3666_v18  ;;  %v3674_v18 = vld [vmem:[%s5201_s3 + $0x70] sm:$0xff]  }
 0x132   :  { %2351 = vperm.xlu1 %3643, %v2041_v22   ;;  %2346 = vperm.xlu0 %3642, %v2040_v54   ;;  %v3675_v22 = vld [vmem:[%s5201_s3 + $0x78] sm:$0xff]   ;;  %v3676_v54 = vld [vmem:[%s5201_s3 + $0x80] sm:$0xff]  }
 0x136   :  { %2271 = vperm.xlu1 %3643, %v2025_v28   ;;  %2266 = vperm.xlu0 %3642, %v2024_v32   ;;  %v3677_v28 = vld [vmem:[%s5201_s3 + $0x88] sm:$0xff]   ;;  %v3678_v32 = vld [vmem:[%s5201_s3 + $0x90] sm:$0xff]  }
 0x138   :  { %3509 = vmatmul.mubr.bf16.gmra.mrb[12].mxu1 %v3667_v55  ;;  %v3679_v55 = vld [vmem:[%s5201_s3 + $0x98] sm:$0xff]  }
 0x139   :  { %3512 = vmatprep.mubr.bf16.mxu1 %v3668_v35  ;;  %v3680_v35 = vld [vmem:[%s5201_s3 + $0xa0] sm:$0xff]  }
 0x13a   :  { %2361 = vperm.xlu1 %3643, %v2043_v48   ;;  %2356 = vperm.xlu0 %3642, %v2042_v46   ;;  %v3681_v48 = vld [vmem:[%s5201_s3 + $0xa8] sm:$0xff]   ;;  %v3682_v46 = vld [vmem:[%s5201_s3 + $0xb0] sm:$0xff]  }
 0x13e   :  { %2281 = vperm.xlu1 %3643, %v2027_v44   ;;  %2276 = vperm.xlu0 %3642, %v2026_v50   ;;  %v3683_v44 = vld [vmem:[%s5201_s3 + $0xb8] sm:$0xff]   ;;  %v3684_v50 = vld [vmem:[%s5201_s3 + $0xc0] sm:$0xff]  }
 0x140   :  { %3513 = vmatmul.mubr.bf16.gmra.mrb[16].mxu1 %v3669_v45  ;;  %v3685_v45 = vld [vmem:[%s5201_s3 + $0xc8] sm:$0xff]  }
 0x141   :  { %3516 = vmatprep.mubr.bf16.mxu1 %v3670_v8  ;;  %v3686_v8 = vld [vmem:[%s5201_s3 + $0xd0] sm:$0xff]  }
 0x142   :  { %2946 = vperm.xlu0 %3642, %v2943_v9   ;;  %v3687_v9 = vld [vmem:[%s5201_s3 + $0xd8] sm:$0xff]  }
 0x148   :  { %3517 = vmatmul.mubr.bf16.gmra.mrb[20].mxu1 %v3671_v33  ;;  %v3688_v33 = vld [vmem:[%s5201_s3 + $0xe0] sm:$0xff]  }
 0x149   :  { %3520 = vmatprep.mubr.bf16.mxu1 %v3672_v58  ;;  %v3689_v58 = vld [vmem:[%s5201_s3 + $0xe8] sm:$0xff]  }
 0x150   :  { %3521 = vmatmul.mubr.bf16.gmra.mrb[24].mxu1 %v3673_v16  ;;  %v3690_v16 = vld [vmem:[%s5201_s3 + $0xf0] sm:$0xff]  }
 0x151   :  { %3524 = vmatprep.mubr.bf16.mxu1 %v3674_v18  ;;  %v3691_v18 = vld [vmem:[%s5201_s3 + $0xf8] sm:$0xff]  }
 0x158   :  { %3525 = vmatmul.mubr.bf16.gmra.mrb[28].mxu1 %v3675_v22  ;;  %v3694_v22 = vld [vmem:[%s5203_s5 + $0x4] ss:$16 sps:$4 sm:$0xff]  }
 0x159   :  { %3528 = vmatprep.mubr.bf16.mxu1 %v3676_v54  ;;  %1730 = vmatprep.mubr.bf16.mxu0 %v3694_v22 }
 0x160   :  { %3529 = vmatmul.mubr.bf16.gmra.mrb[32].mxu1 %v3677_v28 }
 0x161   :  { %3532 = vmatprep.mubr.bf16.mxu1 %v3678_v32 }
 0x168   :  { %3533 = vmatmul.mubr.bf16.gmra.mrb[36].mxu1 %v3679_v55 }
 0x169   :  { %3536 = vmatprep.mubr.bf16.mxu1 %v3680_v35 }
 0x170   :  { %3537 = vmatmul.mubr.bf16.gmra.mrb[40].mxu1 %v3681_v48 }
 0x171   :  { %3540 = vmatprep.mubr.bf16.mxu1 %v3682_v46 }
 0x178   :  { %3541 = vmatmul.mubr.bf16.gmra.mrb[44].mxu1 %v3683_v44 }
 0x179   :  { %3544 = vmatprep.mubr.bf16.mxu1 %v3684_v50 }
 0x180   :  { %3545 = vmatmul.mubr.bf16.gmra.mrb[48].mxu1 %v3685_v45 }
 0x181   :  { %3548 = vmatprep.mubr.bf16.mxu1 %v3686_v8 }
 0x188   :  { %3549 = vmatmul.mubr.bf16.gmra.mrb[52].mxu1 %v3687_v9 }
 0x189   :  { %3552 = vmatprep.mubr.bf16.mxu1 %v3688_v33 }
 0x190   :  { %3553 = vmatmul.mubr.bf16.gmra.mrb[56].mxu1 %v3689_v58 }
 0x191   :  { %3556 = vmatprep.mubr.bf16.mxu1 %v3690_v16 }
 0x198   :  { %3557 = vmatmul.mubr.bf16.gmra.mrb[60].mxu1 %v3691_v18 }
 0x1f3   :  { %v3498_v54 = vpop.f32.mrb[0].mxu1 }
 0x1f4   :  { %v1068_v28 = vadd.f32 %v3498_v54, %v4267_v14  ;;  %v1059_v32 = vpop.f32.mrb[1].mxu1 }
 0x1f5   :  { %v1060_v55 = vadd.f32 %v1059_v32, %v4241_v4  ;;  %v3499_v35 = vpop.f32.mrb[2].mxu1 }
 0x1f6   :  { %v1071_v48 = vadd.f32 %v3499_v35, %v4275_v17  ;;  %v1062_v46 = vpop.f32.mrb[3].mxu1  ;;  %v1316_v50 = vmax.f32 %v1068_v28, 0.0 }
 0x1f7   :  { %v1063_v44 = vadd.f32 %v1062_v46, %v4249_v7  ;;  %v1314_v8 = vmax.f32 %v1060_v55, 0.0 }
 0x1f8   :  { %v1317_v45 = vmax.f32 %v1071_v48, 0.0 }
 0x1f9   :  { %v1315_v9 = vmax.f32 %v1063_v44, 0.0 }
 0x1fa   :  { %v4642_v33 = vpack.c.bf16 %v1317_v45, %v1316_v50 }
 0x1fb   :  { %v4644_v58 = vpack.c.bf16 %v1315_v9, %v1314_v8  ;;  %v3502_v16 = vpop.f32.mrb[4].mxu1 }
 0x1fc   :  { %v1084_v14 = vadd.f32 %v3502_v16, %v4319_v42  ;;  %v1075_v18 = vpop.f32.mrb[5].mxu1 }
 0x1fd   :  { %v1076_v4 = vadd.f32 %v1075_v18, %v4293_v26  ;;  %v3503_v22 = vpop.f32.mrb[6].mxu1 }
 0x1fe   :  { %v1087_v17 = vadd.f32 %v3503_v22, %v4327_v47  ;;  %v1078_v54 = vpop.f32.mrb[7].mxu1  ;;  %v1320_v28 = vmax.f32 %v1084_v14, 0.0 }
 0x1ff   :  { %v1079_v7 = vadd.f32 %v1078_v54, %v4301_v31  ;;  %v1318_v55 = vmax.f32 %v1076_v4, 0.0 }
 0x200   :  { %v1321_v32 = vmax.f32 %v1087_v17, 0.0 }
 0x201   :  { %v1319_v35 = vmax.f32 %v1079_v7, 0.0 }
 0x202   :  { %v4650_v48 = vpack.c.bf16 %v1321_v32, %v1320_v28 }
 0x203   :  { %v4652_v46 = vpack.c.bf16 %v1319_v35, %v1318_v55  ;;  %v3506_v44 = vpop.f32.mrb[8].mxu1 }
 0x204   :  { %v1100_v42 = vadd.f32 %v3506_v44, %v4374_v25  ;;  %v1091_v50 = vpop.f32.mrb[9].mxu1 }
 0x205   :  { %v1092_v26 = vadd.f32 %v1091_v50, %v4345_v59  ;;  %v3507_v45 = vpop.f32.mrb[10].mxu1 }
 0x206   :  { %v1103_v47 = vadd.f32 %v3507_v45, %v4383_v23  ;;  %v1094_v8 = vpop.f32.mrb[11].mxu1  ;;  %v1324_v9 = vmax.f32 %v1100_v42, 0.0 }
 0x207   :  { %v1095_v31 = vadd.f32 %v1094_v8, %v4353_v63  ;;  %v1322_v14 = vmax.f32 %v1092_v26, 0.0 }
 0x208   :  { %v1325_v16 = vmax.f32 %v1103_v47, 0.0 }
 0x209   :  { %v1323_v18 = vmax.f32 %v1095_v31, 0.0 }
 0x20a   :  { %v4658_v4 = vpack.c.bf16 %v1325_v16, %v1324_v9 }
 0x20b   :  { %v4660_v22 = vpack.c.bf16 %v1323_v18, %v1322_v14  ;;  %v3510_v17 = vpop.f32.mrb[12].mxu1 }
 0x20c   :  { %v1116_v25 = vadd.f32 %v3510_v17, %v4438_v15  ;;  %v1107_v54 = vpop.f32.mrb[13].mxu1 }
 0x20d   :  { %v1108_v59 = vadd.f32 %v1107_v54, %v4405_v19  ;;  %v3511_v7 = vpop.f32.mrb[14].mxu1 }
 0x20e   :  { %v1119_v23 = vadd.f32 %v3511_v7, %v4444_v34  ;;  %v1110_v28 = vpop.f32.mrb[15].mxu1  ;;  %v1328_v32 = vmax.f32 %v1116_v25, 0.0 }
 0x20f   :  { %v1111_v63 = vadd.f32 %v1110_v28, %v4411_v29  ;;  %v1326_v35 = vmax.f32 %v1108_v59, 0.0 }
 0x210   :  { %v1329_v55 = vmax.f32 %v1119_v23, 0.0 }
 0x211   :  { %v1327_v44 = vmax.f32 %v1111_v63, 0.0 }
 0x212   :  { %v4666_v42 = vpack.c.bf16 %v1329_v55, %v1328_v32  ;;  %v4681_v32 = vpop.permute.xlu0 %795 }
 0x213   :  { %v4668_v50 = vpack.c.bf16 %v1327_v44, %v1326_v35  ;;  %v3514_v26 = vpop.f32.mrb[16].mxu1 }
 0x214   :  { %v1132_v15 = vadd.f32 %v3514_v26, %v4257_v10  ;;  %v1123_v45 = vpop.f32.mrb[17].mxu1  ;;  %v4675_v10 = vpop.permute.xlu1 %710 }
 0x215   :  { %v1124_v19 = vadd.f32 %v1123_v45, %v4231_v0  ;;  %v3515_v47 = vpop.f32.mrb[18].mxu1 }
 0x216   :  { %v1135_v34 = vadd.f32 %v3515_v47, %v4259_v11  ;;  %v1126_v8 = vpop.f32.mrb[19].mxu1  ;;  %v1332_v31 = vmax.f32 %v1132_v15, 0.0  ;;  %v4690_v47 = vpop.permute.xlu0 %715 }
 0x217   :  { %v1127_v29 = vadd.f32 %v1126_v8, %v4233_v1  ;;  %v1330_v16 = vmax.f32 %v1124_v19, 0.0 }
 0x218   :  { %v1333_v9 = vmax.f32 %v1135_v34, 0.0 }
 0x219   :  { %v1331_v14 = vmax.f32 %v1127_v29, 0.0 }
 0x21a   :  { %v1419_v18 = vpack.c.bf16 %v1333_v9, %v1332_v31 }
 0x21b   :  { %v1418_v17 = vpack.c.bf16 %v1331_v14, %v1330_v16  ;;  %v3518_v25 = vpop.f32.mrb[20].mxu1 }
 0x21c   :  { %v1148_v54 = vadd.f32 %v3518_v25, %v4309_v36  ;;  %v1139_v59 = vpop.f32.mrb[21].mxu1 }
 0x21d   :  { %v1140_v0 = vadd.f32 %v1139_v59, %v4283_v20  ;;  %v3519_v7 = vpop.f32.mrb[22].mxu1  ;;  %3236 = vmatprep.subr.bf16.mxu0 %v1418_v17  ;;  %v4684_v20 = vpop.permute.xlu1 %800 }
 0x21e   :  { %v1151_v11 = vadd.f32 %v3519_v7, %v4311_v38  ;;  %v1142_v23 = vpop.f32.mrb[23].mxu1  ;;  %3237 = vmatpush3.bf16.msra.mxu0 %v4644_v58  ;;  %v1336_v28 = vmax.f32 %v1148_v54, 0.0 }
 0x21f   :  { %v1143_v1 = vadd.f32 %v1142_v23, %v4285_v21  ;;  %3238 = vmatprep.subr.bf16.mxu0 %v1419_v18  ;;  %v1334_v36 = vmax.f32 %v1140_v0, 0.0 }
 0x220   :  { %v1337_v63 = vmax.f32 %v1151_v11, 0.0 }
 0x221   :  { %v1335_v55 = vmax.f32 %v1143_v1, 0.0  ;;  %v4693_v29 = vpop.permute.xlu1 %720 }
 0x222   :  { %v1421_v35 = vpack.c.bf16 %v1337_v63, %v1336_v28  ;;  %3239 = vmatpush3.bf16.msra.mxu0 %v4642_v33 }
 0x223   :  { %v1420_v44 = vpack.c.bf16 %v1335_v55, %v1334_v36  ;;  %v3522_v26 = vpop.f32.mrb[24].mxu1 }
 0x224   :  { %v1164_v38 = vadd.f32 %v3522_v26, %v4361_v5  ;;  %v1155_v15 = vpop.f32.mrb[25].mxu1 }
 0x225   :  { %v1156_v58 = vadd.f32 %v1155_v15, %v4335_v52  ;;  %v3523_v21 = vpop.f32.mrb[26].mxu1  ;;  %3240 = vmatprep.subr.bf16.mxu0 %v1420_v44  ;;  %v4702_v54 = vpop.permute.xlu1 %810 }
 0x226   :  { %v1167_v45 = vadd.f32 %v3523_v21, %v4363_v6  ;;  %v1158_v19 = vpop.f32.mrb[27].mxu1  ;;  %3241 = vmatpush3.bf16.msra.mxu0 %v4652_v46  ;;  %v1340_v34 = vmax.f32 %v1164_v38, 0.0  ;;  %v4697_v46 = vpop.permute.xlu0 %805 }
 0x227   :  { %v1159_v33 = vadd.f32 %v1158_v19, %v4337_v53  ;;  %3242 = vmatprep.subr.bf16.mxu0 %v1421_v35  ;;  %v1338_v5 = vmax.f32 %v1156_v58, 0.0 }
 0x228   :  { %v1341_v8 = vmax.f32 %v1167_v45, 0.0 }
 0x229   :  { %v1339_v31 = vmax.f32 %v1159_v33, 0.0  ;;  %v731_v63 = vpop.permute.xlu1 %730 }
 0x22a   :  { %v1423_v9 = vpack.c.bf16 %v1341_v8, %v1340_v34  ;;  %3243 = vmatpush3.bf16.msra.mxu0 %v4650_v48 }
 0x22b   :  { %v1422_v52 = vpack.c.bf16 %v1339_v31, %v1338_v5  ;;  %v3526_v16 = vpop.f32.mrb[28].mxu1 }
 0x22c   :  { %v1180_v6 = vadd.f32 %v3526_v16, %v4425_v27  ;;  %v1171_v14 = vpop.f32.mrb[29].mxu1 }
 0x22d   :  { %v1172_v18 = vadd.f32 %v1171_v14, %v4392_v60  ;;  %v3527_v53 = vpop.f32.mrb[30].mxu1  ;;  %3244 = vmatprep.subr.bf16.mxu0 %v1422_v52  ;;  %v726_v60 = vpop.permute.xlu0 %725 }
 0x22e   :  { %v1183_v17 = vadd.f32 %v3527_v53, %v4427_v57  ;;  %v1174_v25 = vpop.f32.mrb[31].mxu1  ;;  %3245 = vmatpush3.bf16.msra.mxu0 %v4660_v22  ;;  %v1344_v59 = vmax.f32 %v1180_v6, 0.0 }
 0x22f   :  { %v1175_v48 = vadd.f32 %v1174_v25, %v4396_v3  ;;  %3246 = vmatprep.subr.bf16.mxu0 %v1423_v9  ;;  %v1342_v27 = vmax.f32 %v1172_v18, 0.0 }
 0x230   :  { %v1345_v0 = vmax.f32 %v1183_v17, 0.0 }
 0x231   :  { %v1343_v7 = vmax.f32 %v1175_v48, 0.0  ;;  %v4711_v26 = vpop.permute.xlu0 %815 }
 0x232   :  { %v1425_v11 = vpack.c.bf16 %v1345_v0, %v1344_v59  ;;  %3247 = vmatpush3.bf16.msra.mxu0 %v4658_v4 }
 0x233   :  { %v1424_v23 = vpack.c.bf16 %v1343_v7, %v1342_v27  ;;  %v3530_v1 = vpop.f32.mrb[32].mxu1 }
 0x234   :  { %v1196_v57 = vadd.f32 %v3530_v1, %v4503_v13  ;;  %v1187_v28 = vpop.f32.mrb[33].mxu1 }
 0x235   :  { %v1188_v22 = vadd.f32 %v1187_v28, %v4471_v49  ;;  %v3531_v36 = vpop.f32.mrb[34].mxu1  ;;  %3248 = vmatprep.subr.bf16.mxu0 %v1424_v23  ;;  %v3692_v49 = vld [vmem:[%s5203_s5] ss:$16 sps:$4 sm:$0xff]  }
 0x236   :  { %v1199_v3 = vadd.f32 %v3531_v36, %v4508_v40  ;;  %v1190_v55 = vpop.f32.mrb[35].mxu1  ;;  %3249 = vmatpush3.bf16.msra.mxu0 %v4668_v50  ;;  %v1348_v4 = vmax.f32 %v1196_v57, 0.0  ;;  %v3695_v40 = vld [vmem:[%s5203_s5 + $0x24] ss:$16 sps:$4 sm:$0xff]  }
 0x237   :  { %v1191_v35 = vadd.f32 %v1190_v55, %v4476_v51  ;;  %3250 = vmatprep.subr.bf16.mxu0 %v1425_v11  ;;  %v1346_v38 = vmax.f32 %v1188_v22, 0.0  ;;  %v4722_v51 = vpop.permute.xlu1 %820 }
 0x238   :  { %v1349_v44 = vmax.f32 %v1199_v3, 0.0 }
 0x239   :  { %v1347_v13 = vmax.f32 %v1191_v35, 0.0 }
 0x23a   :  { %v4716_v15 = vpack.c.bf16 %v1349_v44, %v1348_v4  ;;  %3251 = vmatpush3.bf16.msra.mxu0 %v4666_v42  ;;  %v736_v42 = vpop.permute.xlu0 %735 }
 0x23b   :  { %v4724_v50 = vpack.c.bf16 %v1347_v13, %v1346_v38  ;;  %v3534_v58 = vpop.f32.mrb[36].mxu1  ;;  %v741_v52 = vpop.permute.xlu1 %740 }
 0x23c   :  { %v1212_v21 = vadd.f32 %v3534_v58, %v4570_v12  ;;  %v1203_v45 = vpop.f32.mrb[37].mxu1  ;;  %v3697_v12 = vld [vmem:[%s5203_s5 + $0x20] ss:$16 sps:$4 sm:$0xff]  }
 0x23d   :  { %v1204_v19 = vadd.f32 %v1203_v45, %v4541_v41  ;;  %v3535_v33 = vpop.f32.mrb[38].mxu1  ;;  %1731 = vmatmul.mubr.bf16.vlgmr.msra.gmra.mrb[16].mxu0 %v3692_v49  ;;  %v3698_v41 = vld [vmem:[%s5203_s5 + $0x44] ss:$16 sps:$4 sm:$0xff]   ;;  %v3703_v45 = vld [vmem:[%s5203_s5 + $0x60] ss:$16 sps:$4 sm:$0xff]  }
 0x23e   :  { %v1215_v34 = vadd.f32 %v3535_v33, %v4675_v10  ;;  %v1206_v8 = vpop.f32.mrb[39].mxu1  ;;  %1738 = vmatprep.mubr.bf16.mxu0 %v3695_v40  ;;  %v1352_v31 = vmax.f32 %v1212_v21, 0.0  ;;  %v4740_v17 = vpop.permute.xlu0 %825  ;;  %v3704_v33 = vld [vmem:[%s5203_s5 + $0x84] ss:$16 sps:$4 sm:$0xff]  }
 0x23f   :  { %v1207_v5 = vadd.f32 %v1206_v8, %v4546_v43  ;;  %v1350_v16 = vmax.f32 %v1204_v19, 0.0  ;;  %v4743_v27 = vpop.permute.xlu1 %830 }
 0x240   :  { %v1353_v9 = vmax.f32 %v1215_v34, 0.0 }
 0x241   :  { %v1351_v6 = vmax.f32 %v1207_v5, 0.0 }
 0x242   :  { %v4733_v14 = vpack.c.bf16 %v1353_v9, %v1352_v31 }
 0x243   :  { %v4738_v10 = vpack.c.bf16 %v1351_v6, %v1350_v16  ;;  %v3538_v18 = vpop.f32.mrb[40].mxu1  ;;  %v751_v55 = vpop.permute.xlu1 %750 }
 0x244   :  { %v1228_v53 = vadd.f32 %v3538_v18, %v726_v60  ;;  %v1219_v43 = vpop.f32.mrb[41].mxu1  ;;  %v3700_v60 = vld [vmem:[%s5203_s5 + $0x40] ss:$16 sps:$4 sm:$0xff]  }
 0x245   :  { %v1220_v25 = vadd.f32 %v1219_v43, %v4690_v47  ;;  %v3539_v48 = vpop.f32.mrb[42].mxu1  ;;  %1739 = vmatmul.mubr.bf16.gmra.mrb[20].mxu0 %v3697_v12  ;;  %v3701_v47 = vld [vmem:[%s5203_s5 + $0x64] ss:$16 sps:$4 sm:$0xff]   ;;  %v3706_v43 = vld [vmem:[%s5203_s5 + $0x80] ss:$16 sps:$4 sm:$0xff]  }
 0x246   :  { %v1231_v59 = vadd.f32 %v3539_v48, %v731_v63  ;;  %v1222_v0 = vpop.f32.mrb[43].mxu1  ;;  %1746 = vmatprep.mubr.bf16.mxu0 %v3698_v41  ;;  %v1356_v11 = vmax.f32 %v1228_v53, 0.0  ;;  %v746_v63 = vpop.permute.xlu0 %745 }
 0x247   :  { %v1223_v7 = vadd.f32 %v1222_v0, %v4693_v29  ;;  %v1354_v1 = vmax.f32 %v1220_v25, 0.0 }
 0x248   :  { %v1357_v23 = vmax.f32 %v1231_v59, 0.0 }
 0x249   :  { %v1355_v57 = vmax.f32 %v1223_v7, 0.0 }
 0x24a   :  { %v4749_v28 = vpack.c.bf16 %v1357_v23, %v1356_v11 }
 0x24b   :  { %v4754_v22 = vpack.c.bf16 %v1355_v57, %v1354_v1  ;;  %v3542_v36 = vpop.f32.mrb[44].mxu1 }
 0x24c   :  { %v1244_v3 = vadd.f32 %v3542_v36, %v746_v63  ;;  %v1235_v29 = vpop.f32.mrb[45].mxu1 }
 0x24d   :  { %v1236_v35 = vadd.f32 %v1235_v29, %v736_v42  ;;  %v3543_v4 = vpop.f32.mrb[46].mxu1  ;;  %1747 = vmatmul.mubr.bf16.gmra.mrb[24].mxu0 %v3700_v60 }
 0x24e   :  { %v1247_v44 = vadd.f32 %v3543_v4, %v751_v55  ;;  %v1238_v38 = vpop.f32.mrb[47].mxu1  ;;  %1754 = vmatprep.mubr.bf16.mxu0 %v3701_v47  ;;  %v1360_v49 = vmax.f32 %v1244_v3, 0.0 }
 0x24f   :  { %v1239_v13 = vadd.f32 %v1238_v38, %v741_v52  ;;  %v1358_v58 = vmax.f32 %v1236_v35, 0.0 }
 0x250   :  { %v1361_v40 = vmax.f32 %v1247_v44, 0.0 }
 0x251   :  { %v1359_v21 = vmax.f32 %v1239_v13, 0.0 }
 0x252   :  { %v4759_v19 = vpack.c.bf16 %v1361_v40, %v1360_v49 }
 0x253   :  { %v4764_v34 = vpack.c.bf16 %v1359_v21, %v1358_v58  ;;  %v3546_v8 = vpop.f32.mrb[48].mxu1 }
 0x254   :  { %v1260_v42 = vadd.f32 %v3546_v8, %v4487_v62  ;;  %v1251_v5 = vpop.f32.mrb[49].mxu1 }
 0x255   :  { %v1252_v31 = vadd.f32 %v1251_v5, %v4455_v30  ;;  %v3547_v9 = vpop.f32.mrb[50].mxu1  ;;  %1755 = vmatmul.mubr.bf16.gmra.mrb[28].mxu0 %v3703_v45  ;;  %v3707_v30 = vld [vmem:[%s5203_s5 + $0xa4] ss:$16 sps:$4 sm:$0xff]  }
 0x256   :  { %v1263_v52 = vadd.f32 %v3547_v9, %v4492_v37  ;;  %v1254_v16 = vpop.f32.mrb[51].mxu1  ;;  %1762 = vmatprep.mubr.bf16.mxu0 %v3704_v33  ;;  %v1364_v12 = vmax.f32 %v1260_v42, 0.0  ;;  %v3721_v9 = vld [vmem:[%s5203_s5 + $0x28] ss:$16 sps:$4 sm:$0xff]  }
 0x257   :  { %v1255_v6 = vadd.f32 %v1254_v16, %v4457_v39  ;;  %v1362_v18 = vmax.f32 %v1252_v31, 0.0  ;;  %v3727_v16 = vld [vmem:[%s5203_s5 + $0x68] ss:$16 sps:$4 sm:$0xff]  }
 0x258   :  { %v1365_v41 = vmax.f32 %v1263_v52, 0.0  ;;  %v3725_v52 = vld [vmem:[%s5203_s5 + $0x6c] ss:$16 sps:$4 sm:$0xff]  }
 0x259   :  { %v1363_v53 = vmax.f32 %v1255_v6, 0.0  ;;  %v3728_v6 = vld [vmem:[%s5203_s5 + $0x8c] ss:$16 sps:$4 sm:$0xff]  }
 0x25a   :  { %v1435_v62 = vpack.c.bf16 %v1365_v41, %v1364_v12  ;;  %v3730_v12 = vld [vmem:[%s5203_s5 + $0x88] ss:$16 sps:$4 sm:$0xff]   ;;  %v3731_v41 = vld [vmem:[%s5203_s5 + $0xac] ss:$16 sps:$4 sm:$0xff]  }
 0x25b   :  { %v1434_v25 = vpack.c.bf16 %v1363_v53, %v1362_v18  ;;  %v3550_v48 = vpop.f32.mrb[52].mxu1  ;;  %v3733_v18 = vld [vmem:[%s5203_s5 + $0xa8] ss:$16 sps:$4 sm:$0xff]   ;;  %v3734_v53 = vld [vmem:[%s5203_s5 + $0xcc] ss:$16 sps:$4 sm:$0xff]  }
 0x25c   :  { %v1276_v37 = vadd.f32 %v3550_v48, %v4557_v56  ;;  %v1267_v59 = vpop.f32.mrb[53].mxu1 }
 0x25d   :  { %v1268_v39 = vadd.f32 %v1267_v59, %v4525_v61  ;;  %v3551_v0 = vpop.f32.mrb[54].mxu1  ;;  %1763 = vmatmul.mubr.bf16.gmra.mrb[32].mxu0 %v3706_v43  ;;  %3300 = vmatprep.subr.bf16.mxu0 %v1434_v25  ;;  %v3709_v61 = vld [vmem:[%s5203_s5 + $0xa0] ss:$16 sps:$4 sm:$0xff]   ;;  %v3736_v43 = vld [vmem:[%s5203_s5 + $0xc8] ss:$16 sps:$4 sm:$0xff]  }
 0x25e   :  { %v1279_v7 = vadd.f32 %v3551_v0, %v4562_v2  ;;  %v1270_v11 = vpop.f32.mrb[55].mxu1  ;;  %3301 = vmatpush3.bf16.msra.mxu0 %v4724_v50  ;;  %1770 = vmatprep.mubr.bf16.mxu0 %v3707_v30  ;;  %v1368_v1 = vmax.f32 %v1276_v37, 0.0  ;;  %v3710_v2 = vld [vmem:[%s5203_s5 + $0xc4] ss:$16 sps:$4 sm:$0xff]   ;;  %v3739_v30 = vld [vmem:[%s5203_s5 + $0xe8] ss:$16 sps:$4 sm:$0xff]  }
 0x25f   :  { %v1271_v23 = vadd.f32 %v1270_v11, %v4527_v24  ;;  %3302 = vmatprep.subr.bf16.mxu0 %v1435_v62  ;;  %v1366_v60 = vmax.f32 %v1268_v39, 0.0  ;;  %v3737_v62 = vld [vmem:[%s5203_s5 + $0xec] ss:$16 sps:$4 sm:$0xff]  }
 0x260   :  { %v1369_v57 = vmax.f32 %v1279_v7, 0.0  ;;  %v3740_v7 = vld [vmem:[%s5205_s7] sm:$0xff]  }
 0x261   :  { %v1367_v47 = vmax.f32 %v1271_v23, 0.0  ;;  %3576 = vmatprep.mubr.bf16.mxu1 %v3740_v7 }
 0x262   :  { %v1437_v56 = vpack.c.bf16 %v1369_v57, %v1368_v1  ;;  %3303 = vmatpush3.bf16.msra.mxu0 %v4716_v15 }
 0x263   :  { %v1436_v50 = vpack.c.bf16 %v1367_v47, %v1366_v60  ;;  %v3554_v63 = vpop.f32.mrb[56].mxu1 }
 0x264   :  { %v1292_v24 = vadd.f32 %v3554_v63, %v4697_v46  ;;  %v1283_v36 = vpop.f32.mrb[57].mxu1 }
 0x265   :  { %v1284_v3 = vadd.f32 %v1283_v36, %v4681_v32  ;;  %v3555_v29 = vpop.f32.mrb[58].mxu1  ;;  %1771 = vmatmul.mubr.bf16.gmra.mrb[36].mxu0 %v3709_v61  ;;  %3304 = vmatprep.subr.bf16.mxu0 %v1436_v50  ;;  %v3712_v32 = vld [vmem:[%s5203_s5 + $0xc0] ss:$16 sps:$4 sm:$0xff]  }
 0x266   :  { %v1295_v55 = vadd.f32 %v3555_v29, %v4702_v54  ;;  %v1286_v35 = vpop.f32.mrb[59].mxu1  ;;  %3305 = vmatpush3.bf16.msra.mxu0 %v4738_v10  ;;  %1778 = vmatprep.mubr.bf16.mxu0 %v3710_v2  ;;  %v1372_v4 = vmax.f32 %v1292_v24, 0.0  ;;  %v3713_v54 = vld [vmem:[%s5203_s5 + $0xe4] ss:$16 sps:$4 sm:$0xff]  }
 0x267   :  { %v1287_v15 = vadd.f32 %v1286_v35, %v4684_v20  ;;  %3306 = vmatprep.subr.bf16.mxu0 %v1437_v56  ;;  %v1370_v38 = vmax.f32 %v1284_v3, 0.0 }
 0x268   :  { %v1373_v44 = vmax.f32 %v1295_v55, 0.0 }
 0x269   :  { %v1371_v13 = vmax.f32 %v1287_v15, 0.0 }
 0x26a   :  { %v1439_v46 = vpack.c.bf16 %v1373_v44, %v1372_v4  ;;  %3307 = vmatpush3.bf16.msra.mxu0 %v4733_v14 }
 0x26b   :  { %v1438_v10 = vpack.c.bf16 %v1371_v13, %v1370_v38  ;;  %v3558_v49 = vpop.f32.mrb[60].mxu1 }
 0x26c   :  { %v1308_v20 = vadd.f32 %v3558_v49, %v4740_v17  ;;  %v1299_v40 = vpop.f32.mrb[61].mxu1 }
 0x26d   :  { %v1300_v58 = vadd.f32 %v1299_v40, %v4711_v26  ;;  %v3559_v21 = vpop.f32.mrb[62].mxu1  ;;  %1779 = vmatmul.mubr.bf16.gmra.mrb[40].mxu0 %v3712_v32  ;;  %3308 = vmatprep.subr.bf16.mxu0 %v1438_v10  ;;  %v3715_v26 = vld [vmem:[%s5203_s5 + $0xe0] ss:$16 sps:$4 sm:$0xff]  }
 0x26e   :  { %v1311_v45 = vadd.f32 %v3559_v21, %v4743_v27  ;;  %v1302_v33 = vpop.f32.mrb[63].mxu1  ;;  %3309 = vmatpush3.bf16.msra.mxu0 %v4754_v22  ;;  %1786 = vmatprep.mubr.bf16.mxu0 %v3713_v54  ;;  %v1376_v8 = vmax.f32 %v1308_v20, 0.0  ;;  %v3718_v27 = vld [vmem:[%s5203_s5 + $0xc] ss:$16 sps:$4 sm:$0xff]  }
 0x26f   :  { %v1303_v14 = vadd.f32 %v1302_v33, %v4722_v51  ;;  %3310 = vmatprep.subr.bf16.mxu0 %v1439_v46  ;;  %v1374_v5 = vmax.f32 %v1300_v58, 0.0  ;;  %v3716_v51 = vld [vmem:[%s5203_s5 + $0x8] ss:$16 sps:$4 sm:$0xff]  }
 0x270   :  { %v1377_v42 = vmax.f32 %v1311_v45, 0.0 }
 0x271   :  { %v1375_v31 = vmax.f32 %v1303_v14, 0.0 }
 0x272   :  { %v1441_v17 = vpack.c.bf16 %v1377_v42, %v1376_v8  ;;  %3311 = vmatpush3.bf16.msra.mxu0 %v4749_v28  ;;  %v3719_v28 = vld [vmem:[%s5203_s5 + $0x2c] ss:$16 sps:$4 sm:$0xff]  }
 0x273   :  { %v1440_v22 = vpack.c.bf16 %v1375_v31, %v1374_v5 }
 0x275   :  { %1787 = vmatmul.mubr.bf16.gmra.mrb[44].mxu0 %v3715_v26  ;;  %3312 = vmatprep.subr.bf16.mxu0 %v1440_v22 }
 0x276   :  { %3313 = vmatpush3.bf16.msra.mxu0 %v4764_v34  ;;  %1827 = vmatprep.mubr.bf16.mxu0 %v3718_v27  ;;  %v3722_v34 = vld [vmem:[%s5203_s5 + $0x4c] ss:$16 sps:$4 sm:$0xff]  }
 0x277   :  { %3314 = vmatprep.subr.bf16.mxu0 %v1441_v17 }
 0x27a   :  { %3315 = vmatpush3.bf16.msra.mxu0 %v4759_v19  ;;  %v3724_v19 = vld [vmem:[%s5203_s5 + $0x48] ss:$16 sps:$4 sm:$0xff]  }
 0x27d   :  { %1828 = vmatmul.mubr.bf16.vlgmr.msra.gmra.mrb[48].mxu0 %v3716_v51 }
 0x27e   :  { %1835 = vmatprep.mubr.bf16.mxu0 %v3719_v28  ;;  %v1461_v28 = vpop.permute.xlu0 %1460 }
 0x285   :  { %1836 = vmatmul.mubr.bf16.gmra.mrb[52].mxu0 %v3721_v9 }
 0x286   :  { %1843 = vmatprep.mubr.bf16.mxu0 %v3722_v34 }
 0x28d   :  { %1844 = vmatmul.mubr.bf16.gmra.mrb[56].mxu0 %v3724_v19 }
 0x28e   :  { %1851 = vmatprep.mubr.bf16.mxu0 %v3725_v52 }
 0x295   :  { %1852 = vmatmul.mubr.bf16.gmra.mrb[60].mxu0 %v3727_v16  ;;  %v1466_v16 = vpop.permute.xlu1 %1465 }
 0x296   :  { %1859 = vmatprep.mubr.bf16.mxu0 %v3728_v6 }
 0x29d   :  { %1860 = vmatmul.mubr.bf16.gmra.mrb[64].mxu0 %v3730_v12 }
 0x29e   :  { %1867 = vmatprep.mubr.bf16.mxu0 %v3731_v41 }
 0x2a5   :  { %1868 = vmatmul.mubr.bf16.gmra.mrb[68].mxu0 %v3733_v18 }
 0x2a6   :  { %1875 = vmatprep.mubr.bf16.mxu0 %v3734_v53 }
 0x2ad   :  { %1876 = vmatmul.mubr.bf16.gmra.mrb[72].mxu0 %v3736_v43 }
 0x2ae   :  { %1883 = vmatprep.mubr.bf16.mxu0 %v3737_v62 }
 0x2b5   :  { %1884 = vmatmul.mubr.bf16.gmra.mrb[76].mxu0 %v3739_v30 }
 0x310   :  { %v3252_v25 = vpop.f32.mrb[16].mxu0 }
 0x311   :  { %v3253_v48 = vpop.f32.mrb[17].mxu0 }
 0x312   :  { %v3254_v37 = vadd.f32 %v3253_v48, %v3252_v25  ;;  %v3255_v59 = vpop.f32.mrb[18].mxu0  ;;  %v1471_v25 = vpop.permute.xlu0 %1470 }
 0x313   :  { %v3256_v39 = vpop.f32.mrb[19].mxu0 }
 0x314   :  { %v3257_v0 = vadd.f32 %v3256_v39, %v3255_v59  ;;  %v1733_v34 = vadd.f32 %v3254_v37, %v1461_v28 }
 0x316   :  { %v1736_v12 = vadd.f32 %v3257_v0, %v1466_v16 }
 0x318   :  { %v3258_v11 = vpop.f32.mrb[20].mxu0 }
 0x319   :  { %v3259_v23 = vpop.f32.mrb[21].mxu0 }
 0x31a   :  { %v3260_v1 = vadd.f32 %v3259_v23, %v3258_v11  ;;  %v3261_v57 = vpop.f32.mrb[22].mxu0  ;;  %v1476_v23 = vpop.permute.xlu1 %1475 }
 0x31b   :  { %v3262_v60 = vpop.f32.mrb[23].mxu0 }
 0x31c   :  { %v3263_v47 = vadd.f32 %v3262_v60, %v3261_v57  ;;  %v1741_v59 = vadd.f32 %v3260_v1, %v1471_v25 }
 0x31e   :  { %v1744_v37 = vadd.f32 %v3263_v47, %v1476_v23 }
 0x320   :  { %v3264_v61 = vpop.f32.mrb[24].mxu0 }
 0x321   :  { %v3265_v56 = vpop.f32.mrb[25].mxu0 }
 0x322   :  { %v4862_v2 = vadd.f32 %v3265_v56, %v3264_v61  ;;  %v3267_v50 = vpop.f32.mrb[26].mxu0 }
 0x323   :  { %v3268_v63 = vpop.f32.mrb[27].mxu0 }
 0x324   :  { %v4864_v24 = vadd.f32 %v3268_v63, %v3267_v50 }
 0x328   :  { %v3270_v36 = vpop.f32.mrb[28].mxu0 }
 0x329   :  { %v3271_v3 = vpop.f32.mrb[29].mxu0 }
 0x32a   :  { %v4866_v29 = vadd.f32 %v3271_v3, %v3270_v36  ;;  %v3273_v55 = vpop.f32.mrb[30].mxu0  ;;  %v1481_v36 = vpop.permute.xlu0 %1480 }
 0x32b   :  { %v3274_v35 = vpop.f32.mrb[31].mxu0 }
 0x32c   :  { %v4868_v15 = vadd.f32 %v3274_v35, %v3273_v55  ;;  %v1749_v55 = vadd.f32 %v4862_v2, %v1481_v36 }
 0x330   :  { %v3276_v4 = vpop.f32.mrb[32].mxu0 }
 0x331   :  { %v3277_v44 = vpop.f32.mrb[33].mxu0 }
 0x332   :  { %v4870_v38 = vadd.f32 %v3277_v44, %v3276_v4  ;;  %v3279_v13 = vpop.f32.mrb[34].mxu0  ;;  %v1486_v44 = vpop.permute.xlu1 %1485 }
 0x333   :  { %v3280_v32 = vpop.f32.mrb[35].mxu0 }
 0x334   :  { %v4872_v46 = vadd.f32 %v3280_v32, %v3279_v13  ;;  %v1752_v32 = vadd.f32 %v4864_v24, %v1486_v44 }
 0x338   :  { %v3282_v54 = vpop.f32.mrb[36].mxu0 }
 0x339   :  { %v3283_v10 = vpop.f32.mrb[37].mxu0 }
 0x33a   :  { %v4874_v49 = vadd.f32 %v3283_v10, %v3282_v54  ;;  %v3285_v20 = vpop.f32.mrb[38].mxu0 }
 0x33b   :  { %v3286_v40 = vpop.f32.mrb[39].mxu0 }
 0x33c   :  { %v4876_v58 = vadd.f32 %v3286_v40, %v3285_v20 }
 0x340   :  { %v3288_v21 = vpop.f32.mrb[40].mxu0 }
 0x341   :  { %v3289_v45 = vpop.f32.mrb[41].mxu0 }
 0x342   :  { %v4878_v33 = vadd.f32 %v3289_v45, %v3288_v21  ;;  %v3291_v14 = vpop.f32.mrb[42].mxu0  ;;  %v1491_v45 = vpop.permute.xlu0 %1490 }
 0x343   :  { %v3292_v8 = vpop.f32.mrb[43].mxu0 }
 0x344   :  { %v4880_v42 = vadd.f32 %v3292_v8, %v3291_v14  ;;  %v1757_v8 = vadd.f32 %v4866_v29, %v1491_v45 }
 0x346   :  { %v1501_v16 = vpop.permute.xlu0 %1500 }
 0x348   :  { %v3294_v5 = vpop.f32.mrb[44].mxu0 }
 0x349   :  { %v3295_v31 = vpop.f32.mrb[45].mxu0 }
 0x34a   :  { %v4882_v26 = vadd.f32 %v3295_v31, %v3294_v5  ;;  %v3297_v17 = vpop.f32.mrb[46].mxu0 }
 0x34b   :  { %v3298_v27 = vpop.f32.mrb[47].mxu0 }
 0x34c   :  { %v4884_v22 = vadd.f32 %v3298_v27, %v3297_v17  ;;  %v1496_v17 = vpop.permute.xlu1 %1495 }
 0x350   :  { %v3316_v51 = vpop.f32.mrb[48].mxu0 }
 0x351   :  { %v3317_v9 = vpop.f32.mrb[49].mxu0 }
 0x352   :  { %v3318_v19 = vadd.f32 %v3317_v9, %v3316_v51  ;;  %v3319_v52 = vpop.f32.mrb[50].mxu0  ;;  %v1760_v51 = vadd.f32 %v4868_v15, %v1496_v17 }
 0x353   :  { %v3320_v6 = vpop.f32.mrb[51].mxu0 }
 0x354   :  { %v1830_v41 = vadd.f32 %v3318_v19, %v1733_v34  ;;  %v3321_v18 = vadd.f32 %v3320_v6, %v3319_v52 }
 0x356   :  { %v1833_v53 = vadd.f32 %v3321_v18, %v1736_v12  ;;  %v1892_v43 = vmax.f32 %v1830_v41, 0.0  ;;  %v1765_v12 = vadd.f32 %v4870_v38, %v1501_v16  ;;  %v3745_v16 = vld [vmem:[%s5205_s7 + $0x28] sm:$0xff]  }
 0x358   :  { %v1893_v62 = vmax.f32 %v1833_v53, 0.0  ;;  %v3322_v30 = vpop.f32.mrb[52].mxu0  ;;  %v1506_v53 = vpop.permute.xlu1 %1505 }
 0x359   :  { %v3323_v48 = vpop.f32.mrb[53].mxu0 }
 0x35a   :  { %v3324_v39 = vadd.f32 %v3323_v48, %v3322_v30  ;;  %v3325_v7 = vpop.f32.mrb[54].mxu0  ;;  %v1972_v11 = vpack.c.bf16 %v1893_v62, %v1892_v43  ;;  %v1768_v62 = vadd.f32 %v4872_v46, %v1506_v53  ;;  %v3751_v53 = vld [vmem:[%s5205_s7 + $0x58] sm:$0xff]  }
 0x35b   :  { %v3326_v57 = vpop.f32.mrb[55].mxu0 }
 0x35c   :  { %v1838_v60 = vadd.f32 %v3324_v39, %v1741_v59  ;;  %v3327_v61 = vadd.f32 %v3326_v57, %v3325_v7  ;;  %3560 = vmatprep.subr.bf16.mxu1 %v1972_v11  ;;  %v1511_v7 = vpop.permute.xlu0 %1510 }
 0x35d   :  { %3561 = vmatpush3.bf16.msra.mxu1 %v1972_v11  ;;  %v1773_v23 = vadd.f32 %v4874_v49, %v1511_v7  ;;  %v3760_v7 = vld [vmem:[%s5205_s7 + $0xa0] sm:$0xff]  }
 0x35e   :  { %v1841_v0 = vadd.f32 %v3327_v61, %v1744_v37  ;;  %v1894_v56 = vmax.f32 %v1838_v60, 0.0  ;;  %v1516_v60 = vpop.permute.xlu1 %1515 }
 0x360   :  { %v1895_v50 = vmax.f32 %v1841_v0, 0.0  ;;  %v3328_v63 = vpop.f32.mrb[56].mxu0  ;;  %v1776_v0 = vadd.f32 %v4876_v58, %v1516_v60  ;;  %v3766_v60 = vld [vmem:[%s5205_s7 + $0xd0] sm:$0xff]  }
 0x361   :  { %v3329_v3 = vpop.f32.mrb[57].mxu0 }
 0x362   :  { %v3330_v35 = vadd.f32 %v3329_v3, %v3328_v63  ;;  %v3331_v1 = vpop.f32.mrb[58].mxu0  ;;  %v1973_v4 = vpack.c.bf16 %v1895_v50, %v1894_v56 }
 0x363   :  { %v3332_v13 = vpop.f32.mrb[59].mxu0 }
 0x364   :  { %v1846_v47 = vadd.f32 %v3330_v35, %v1749_v55  ;;  %v3333_v54 = vadd.f32 %v3332_v13, %v3331_v1  ;;  %3562 = vmatprep.subr.bf16.mxu1 %v1973_v4  ;;  %v1521_v55 = vpop.permute.xlu0 %1520  ;;  %v1526_v13 = vpop.permute.xlu1 %1525 }
 0x365   :  { %3563 = vmatpush3.bf16.msra.mxu1 %v1973_v4  ;;  %v1781_v1 = vadd.f32 %v4878_v33, %v1521_v55 }
 0x366   :  { %v1849_v10 = vadd.f32 %v3333_v54, %v1752_v32  ;;  %v1896_v20 = vmax.f32 %v1846_v47, 0.0  ;;  %v1784_v47 = vadd.f32 %v4880_v42, %v1526_v13 }
 0x368   :  { %v1897_v40 = vmax.f32 %v1849_v10, 0.0  ;;  %v3334_v21 = vpop.f32.mrb[60].mxu0  ;;  %v1531_v45 = vpop.permute.xlu0 %1530 }
 0x369   :  { %v3335_v14 = vpop.f32.mrb[61].mxu0 }
 0x36a   :  { %v3336_v2 = vadd.f32 %v3335_v14, %v3334_v21  ;;  %v3337_v5 = vpop.f32.mrb[62].mxu0  ;;  %v1974_v31 = vpack.c.bf16 %v1897_v40, %v1896_v20 }
 0x36b   :  { %v3338_v27 = vpop.f32.mrb[63].mxu0 }
 0x36c   :  { %v1854_v24 = vadd.f32 %v3336_v2, %v1757_v8  ;;  %v3339_v28 = vadd.f32 %v3338_v27, %v3337_v5  ;;  %3564 = vmatprep.subr.bf16.mxu1 %v1974_v31  ;;  %v1789_v8 = vadd.f32 %v4882_v26, %v1531_v45  ;;  %v3741_v26 = vld [vmem:[%s5205_s7 + $0x8] sm:$0xff]  }
 0x36d   :  { %3565 = vmatpush3.bf16.msra.mxu1 %v1974_v31  ;;  %v1536_v31 = vpop.permute.xlu1 %1535 }
 0x36e   :  { %v1857_v9 = vadd.f32 %v3339_v28, %v1760_v51  ;;  %v1898_v34 = vmax.f32 %v1854_v24, 0.0  ;;  %v1792_v27 = vadd.f32 %v4884_v22, %v1536_v31  ;;  %v3743_v22 = vld [vmem:[%s5205_s7 + $0x18] sm:$0xff]  }
 0x370   :  { %v1899_v19 = vmax.f32 %v1857_v9, 0.0  ;;  %v3340_v52 = vpop.f32.mrb[64].mxu0 }
 0x371   :  { %v3341_v6 = vpop.f32.mrb[65].mxu0 }
 0x372   :  { %v3342_v29 = vadd.f32 %v3341_v6, %v3340_v52  ;;  %v3343_v41 = vpop.f32.mrb[66].mxu0  ;;  %v1975_v18 = vpack.c.bf16 %v1899_v19, %v1898_v34  ;;  %v3742_v19 = vld [vmem:[%s5205_s7 + $0x10] sm:$0xff]   ;;  %v3744_v52 = vld [vmem:[%s5205_s7 + $0x20] sm:$0xff]  }
 0x373   :  { %v3344_v43 = vpop.f32.mrb[67].mxu0  ;;  %v3746_v6 = vld [vmem:[%s5205_s7 + $0x30] sm:$0xff]  }
 0x374   :  { %v1862_v15 = vadd.f32 %v3342_v29, %v1765_v12  ;;  %v3345_v30 = vadd.f32 %v3344_v43, %v3343_v41  ;;  %3566 = vmatprep.subr.bf16.mxu1 %v1975_v18  ;;  %v3747_v12 = vld [vmem:[%s5205_s7 + $0x38] sm:$0xff]   ;;  %v3748_v29 = vld [vmem:[%s5205_s7 + $0x40] sm:$0xff]   ;;  %v3749_v41 = vld [vmem:[%s5205_s7 + $0x48] sm:$0xff]  }
 0x375   :  { %3567 = vmatpush3.bf16.msra.mxu1 %v1975_v18  ;;  %v3750_v18 = vld [vmem:[%s5205_s7 + $0x50] sm:$0xff]   ;;  %v3752_v43 = vld [vmem:[%s5205_s7 + $0x60] sm:$0xff]  }
 0x376   :  { %v1865_v25 = vadd.f32 %v3345_v30, %v1768_v62  ;;  %v1900_v48 = vmax.f32 %v1862_v15, 0.0  ;;  %v3753_v62 = vld [vmem:[%s5205_s7 + $0x68] sm:$0xff]   ;;  %v3754_v15 = vld [vmem:[%s5205_s7 + $0x70] sm:$0xff]   ;;  %v3755_v30 = vld [vmem:[%s5205_s7 + $0x78] sm:$0xff]  }
 0x378   :  { %v1901_v59 = vmax.f32 %v1865_v25, 0.0  ;;  %v3346_v39 = vpop.f32.mrb[68].mxu0  ;;  %v3756_v25 = vld [vmem:[%s5205_s7 + $0x80] sm:$0xff]  }
 0x379   :  { %v3347_v11 = vpop.f32.mrb[69].mxu0 }
 0x37a   :  { %v3348_v38 = vadd.f32 %v3347_v11, %v3346_v39  ;;  %v3349_v57 = vpop.f32.mrb[70].mxu0  ;;  %v1976_v37 = vpack.c.bf16 %v1901_v59, %v1900_v48  ;;  %v3757_v48 = vld [vmem:[%s5205_s7 + $0x88] sm:$0xff]   ;;  %v3758_v59 = vld [vmem:[%s5205_s7 + $0x90] sm:$0xff]   ;;  %v3759_v39 = vld [vmem:[%s5205_s7 + $0x98] sm:$0xff]  }
 0x37b   :  { %v3350_v61 = vpop.f32.mrb[71].mxu0  ;;  %v3761_v11 = vld [vmem:[%s5205_s7 + $0xa8] sm:$0xff]  }
 0x37c   :  { %v1870_v46 = vadd.f32 %v3348_v38, %v1773_v23  ;;  %v3351_v56 = vadd.f32 %v3350_v61, %v3349_v57  ;;  %3568 = vmatprep.subr.bf16.mxu1 %v1976_v37  ;;  %v3762_v23 = vld [vmem:[%s5205_s7 + $0xb0] sm:$0xff]   ;;  %v3763_v38 = vld [vmem:[%s5205_s7 + $0xb8] sm:$0xff]   ;;  %v3764_v57 = vld [vmem:[%s5205_s7 + $0xc0] sm:$0xff]  }
 0x37d   :  { %3569 = vmatpush3.bf16.msra.mxu1 %v1976_v37  ;;  %v3765_v37 = vld [vmem:[%s5205_s7 + $0xc8] sm:$0xff]   ;;  %v3767_v61 = vld [vmem:[%s5205_s7 + $0xd8] sm:$0xff]  }
 0x37e   :  { %v1873_v50 = vadd.f32 %v3351_v56, %v1776_v0  ;;  %v1902_v63 = vmax.f32 %v1870_v46, 0.0  ;;  %v3768_v0 = vld [vmem:[%s5205_s7 + $0xe0] sm:$0xff]   ;;  %v3769_v46 = vld [vmem:[%s5205_s7 + $0xe8] sm:$0xff]   ;;  %v3770_v56 = vld [vmem:[%s5205_s7 + $0xf0] sm:$0xff]  }
 0x380   :  { %v1903_v36 = vmax.f32 %v1873_v50, 0.0  ;;  %v3352_v3 = vpop.f32.mrb[72].mxu0  ;;  %v4988_v50 = vpop.permute.xlu0 %2126 }
 0x381   :  { %v3353_v35 = vpop.f32.mrb[73].mxu0 }
 0x382   :  { %v3354_v49 = vadd.f32 %v3353_v35, %v3352_v3  ;;  %v3355_v4 = vpop.f32.mrb[74].mxu0  ;;  %v1977_v44 = vpack.c.bf16 %v1903_v36, %v1902_v63  ;;  %v4990_v63 = vpop.permute.xlu1 %2131  ;;  %v3771_v36 = vld [vmem:[%s5205_s7 + $0xf8] sm:$0xff]  }
 0x383   :  { %v3356_v32 = vpop.f32.mrb[75].mxu0 }
 0x384   :  { %v1878_v58 = vadd.f32 %v3354_v49, %v1781_v1  ;;  %v3357_v54 = vadd.f32 %v3356_v32, %v3355_v4  ;;  %3570 = vmatprep.subr.bf16.mxu1 %v1977_v44  ;;  %v2047_v3 = vpop.permute.xlu0 %2046 }
 0x385   :  { %3571 = vmatpush3.bf16.msra.mxu1 %v1977_v44 }
 0x386   :  { %v1881_v10 = vadd.f32 %v3357_v54, %v1784_v47  ;;  %v1904_v20 = vmax.f32 %v1878_v58, 0.0  ;;  %v2052_v55 = vpop.permute.xlu1 %2051 }
 0x388   :  { %v1905_v40 = vmax.f32 %v1881_v10, 0.0  ;;  %v3358_v21 = vpop.f32.mrb[76].mxu0  ;;  %v4995_v35 = vpop.permute.xlu0 %2136  ;;  %v5010_v10 = vld [vmem:[%s5207_s9] sm:$0xff] }
 0x389   :  { %v3359_v14 = vpop.f32.mrb[77].mxu0 }
 0x38a   :  { %v3360_v33 = vadd.f32 %v3359_v14, %v3358_v21  ;;  %v3361_v2 = vpop.f32.mrb[78].mxu0  ;;  %v1978_v5 = vpack.c.bf16 %v1905_v40, %v1904_v20  ;;  %v4997_v1 = vpop.permute.xlu1 %2141  ;;  %v3177_v20 = vcombine.high %v5010_v10, %v5010_v10 }
 0x38b   :  { %v3362_v17 = vpop.f32.mrb[79].mxu0 }
 0x38c   :  { %v1886_v42 = vadd.f32 %v3360_v33, %v1789_v8  ;;  %v3363_v51 = vadd.f32 %v3362_v17, %v3361_v2  ;;  %3572 = vmatprep.subr.bf16.mxu1 %v1978_v5  ;;  %v2057_v49 = vpop.permute.xlu0 %2056  ;;  %2995 = vmatprep.mubr.bf16.mxu0 %v3177_v20 }
 0x38d   :  { %3573 = vmatpush3.bf16.msra.mxu1 %v1978_v5 }
 0x38e   :  { %v1889_v24 = vadd.f32 %v3363_v51, %v1792_v27  ;;  %v1906_v28 = vmax.f32 %v1886_v42, 0.0  ;;  %v2062_v4 = vpop.permute.xlu1 %2061 }
 0x390   :  { %v1907_v9 = vmax.f32 %v1889_v24, 0.0  ;;  %v4999_v44 = vpop.permute.xlu0 %2146 }
 0x392   :  { %v1979_v34 = vpack.c.bf16 %v1907_v9, %v1906_v28  ;;  %v5001_v13 = vpop.permute.xlu1 %2151 }
 0x394   :  { %3574 = vmatprep.subr.bf16.mxu1 %v1979_v34  ;;  %v2067_v32 = vpop.permute.xlu0 %2066 }
 0x395   :  { %3575 = vmatpush3.bf16.msra.mxu1 %v1979_v34 }
 0x396   :  { %v2072_v47 = vpop.permute.xlu1 %2071 }
 0x398   :  { %3577 = vmatmul.mubr.bf16.vlgmr.msra.gmra.mrb[64].mxu1 %v3741_v26  ;;  %v5003_v58 = vpop.permute.xlu0 %2156 }
 0x399   :  { %3580 = vmatprep.mubr.bf16.mxu1 %v3742_v19 }
 0x39a   :  { %v5005_v54 = vpop.permute.xlu1 %2161 }
 0x39c   :  { %v2077_v40 = vpop.permute.xlu0 %2076 }
 0x39e   :  { %v2082_v21 = vpop.permute.xlu1 %2081 }
 0x3a0   :  { %3581 = vmatmul.mubr.bf16.gmra.mrb[68].mxu1 %v3743_v22  ;;  %v5014_v45 = vpop.permute.xlu0 %2166 }
 0x3a1   :  { %3584 = vmatprep.mubr.bf16.mxu1 %v3744_v52 }
 0x3a2   :  { %v5016_v14 = vpop.permute.xlu1 %2171 }
 0x3a4   :  { %v2087_v8 = vpop.permute.xlu0 %2086 }
 0x3a6   :  { %v2092_v33 = vpop.permute.xlu1 %2091 }
 0x3a8   :  { %3585 = vmatmul.mubr.bf16.gmra.mrb[72].mxu1 %v3745_v16  ;;  %v5018_v2 = vpop.permute.xlu0 %2176 }
 0x3a9   :  { %3588 = vmatprep.mubr.bf16.mxu1 %v3746_v6 }
 0x3aa   :  { %v5020_v5 = vpop.permute.xlu1 %2181 }
 0x3ac   :  { %v2097_v31 = vpop.permute.xlu0 %2096 }
 0x3ae   :  { %v2102_v17 = vpop.permute.xlu1 %2101 }
 0x3b0   :  { %3589 = vmatmul.mubr.bf16.gmra.mrb[76].mxu1 %v3747_v12  ;;  %v5022_v27 = vpop.permute.xlu0 %2186 }
 0x3b1   :  { %3592 = vmatprep.mubr.bf16.mxu1 %v3748_v29 }
 0x3b2   :  { %v5024_v42 = vpop.permute.xlu1 %2191 }
 0x3b4   :  { %v2107_v51 = vpop.permute.xlu0 %2106 }
 0x3b6   :  { %v5026_v24 = vpop.permute.xlu1 %2111 }
 0x3b8   :  { %3593 = vmatmul.mubr.bf16.gmra.mrb[80].mxu1 %v3749_v41  ;;  %v5028_v28 = vpop.permute.xlu0 %2196 }
 0x3b9   :  { %3596 = vmatprep.mubr.bf16.mxu1 %v3750_v18 }
 0x3ba   :  { %v5030_v9 = vpop.permute.xlu1 %2201 }
 0x3bc   :  { %v2117_v34 = vpop.permute.xlu0 %2116 }
 0x3be   :  { %v2122_v26 = vpop.permute.xlu1 %2121 }
 0x3c0   :  { %3597 = vmatmul.mubr.bf16.gmra.mrb[84].mxu1 %v3751_v53  ;;  %v5032_v19 = vpop.permute.xlu0 %2286 }
 0x3c1   :  { %3600 = vmatprep.mubr.bf16.mxu1 %v3752_v43 }
 0x3c2   :  { %v5034_v22 = vpop.permute.xlu1 %2291 }
 0x3c4   :  { %v5036_v53 = vpop.permute.xlu0 %2206 }
 0x3c8   :  { %3601 = vmatmul.mubr.bf16.gmra.mrb[88].mxu1 %v3753_v62 }
 0x3c9   :  { %3604 = vmatprep.mubr.bf16.mxu1 %v3754_v15 }
 0x3d0   :  { %3605 = vmatmul.mubr.bf16.gmra.mrb[92].mxu1 %v3755_v30  ;;  %v5038_v30 = vpop.permute.xlu1 %2211 }
 0x3d1   :  { %3608 = vmatprep.mubr.bf16.mxu1 %v3756_v25 }
 0x3d8   :  { %3609 = vmatmul.mubr.bf16.gmra.mrb[96].mxu1 %v3757_v48 }
 0x3d9   :  { %3612 = vmatprep.mubr.bf16.mxu1 %v3758_v59 }
 0x3e0   :  { %3613 = vmatmul.mubr.bf16.gmra.mrb[100].mxu1 %v3759_v39 }
 0x3e1   :  { %3616 = vmatprep.mubr.bf16.mxu1 %v3760_v7 }
 0x3e8   :  { %3617 = vmatmul.mubr.bf16.gmra.mrb[104].mxu1 %v3761_v11 }
 0x3e9   :  { %3620 = vmatprep.mubr.bf16.mxu1 %v3762_v23 }
 0x3f0   :  { %3621 = vmatmul.mubr.bf16.gmra.mrb[108].mxu1 %v3763_v38  ;;  %v5044_v38 = vpop.permute.xlu0 %2296 }
 0x3f1   :  { %3624 = vmatprep.mubr.bf16.mxu1 %v3764_v57 }
 0x3f8   :  { %3625 = vmatmul.mubr.bf16.gmra.mrb[112].mxu1 %v3765_v37 }
 0x3f9   :  { %3628 = vmatprep.mubr.bf16.mxu1 %v3766_v60 }
 0x400   :  { %3629 = vmatmul.mubr.bf16.gmra.mrb[116].mxu1 %v3767_v61 }
 0x401   :  { %3632 = vmatprep.mubr.bf16.mxu1 %v3768_v0  ;;  %v5046_v0 = vpop.permute.xlu1 %2301 }
 0x408   :  { %3633 = vmatmul.mubr.bf16.gmra.mrb[120].mxu1 %v3769_v46 }
 0x409   :  { %3636 = vmatprep.mubr.bf16.mxu1 %v3770_v56 }
 0x410   :  { %3637 = vmatmul.mubr.bf16.gmra.mrb[124].mxu1 %v3771_v36 }
 0x46b   :  { %v3578_v52 = vpop.f32.mrb[64].mxu1 }
 0x46c   :  { %v2599_v16 = vadd.f32 %v3578_v52, %v2057_v49  ;;  %v2590_v6 = vpop.f32.mrb[65].mxu1 }
 0x46d   :  { %v2591_v12 = vadd.f32 %v2590_v6, %v2047_v3  ;;  %v3579_v29 = vpop.f32.mrb[66].mxu1 }
 0x46e   :  { %v2602_v41 = vadd.f32 %v3579_v29, %v2062_v4  ;;  %v2593_v18 = vpop.f32.mrb[67].mxu1  ;;  %v2847_v62 = vmax.f32 %v2599_v16, 0.0  ;;  %v5050_v4 = vpop.permute.xlu0 %2216 }
 0x46f   :  { %v2594_v43 = vadd.f32 %v2593_v18, %v2052_v55  ;;  %v2845_v25 = vmax.f32 %v2591_v12, 0.0 }
 0x470   :  { %v2848_v15 = vmax.f32 %v2602_v41, 0.0 }
 0x471   :  { %v2846_v48 = vmax.f32 %v2594_v43, 0.0 }
 0x472   :  { %v5040_v59 = vpack.c.bf16 %v2848_v15, %v2847_v62  ;;  %v5056_v43 = vpop.permute.xlu0 %2306 }
 0x473   :  { %v5042_v39 = vpack.c.bf16 %v2846_v48, %v2845_v25  ;;  %v3582_v7 = vpop.f32.mrb[68].mxu1 }
 0x474   :  { %v2615_v11 = vadd.f32 %v3582_v7, %v2077_v40  ;;  %v2606_v23 = vpop.f32.mrb[69].mxu1 }
 0x475   :  { %v2607_v57 = vadd.f32 %v2606_v23, %v2067_v32  ;;  %v3583_v37 = vpop.f32.mrb[70].mxu1  ;;  %v5054_v32 = vpop.permute.xlu1 %2221 }
 0x476   :  { %v2618_v60 = vadd.f32 %v3583_v37, %v2082_v21  ;;  %v2609_v61 = vpop.f32.mrb[71].mxu1  ;;  %v2851_v56 = vmax.f32 %v2615_v11, 0.0 }
 0x477   :  { %v2610_v46 = vadd.f32 %v2609_v61, %v2072_v47  ;;  %v2849_v3 = vmax.f32 %v2607_v57, 0.0 }
 0x478   :  { %v2852_v36 = vmax.f32 %v2618_v60, 0.0 }
 0x479   :  { %v2850_v55 = vmax.f32 %v2610_v46, 0.0  ;;  %v5060_v48 = vpop.permute.xlu1 %2311 }
 0x47a   :  { %v5048_v49 = vpack.c.bf16 %v2852_v36, %v2851_v56 }
 0x47b   :  { %v5052_v20 = vpack.c.bf16 %v2850_v55, %v2849_v3  ;;  %v3586_v40 = vpop.f32.mrb[72].mxu1 }
 0x47c   :  { %v2631_v52 = vadd.f32 %v3586_v40, %v2097_v31  ;;  %v2622_v16 = vpop.f32.mrb[73].mxu1 }
 0x47d   :  { %v2623_v21 = vadd.f32 %v2622_v16, %v2087_v8  ;;  %v3587_v6 = vpop.f32.mrb[74].mxu1  ;;  %v5067_v56 = vpop.permute.xlu1 %2231 }
 0x47e   :  { %v2634_v12 = vadd.f32 %v3587_v6, %v2102_v17  ;;  %v2625_v29 = vpop.f32.mrb[75].mxu1  ;;  %v2855_v41 = vmax.f32 %v2631_v52, 0.0 }
 0x47f   :  { %v2626_v47 = vadd.f32 %v2625_v29, %v2092_v33  ;;  %v2853_v62 = vmax.f32 %v2623_v21, 0.0  ;;  %v5064_v33 = vpop.permute.xlu0 %2226 }
 0x480   :  { %v2856_v18 = vmax.f32 %v2634_v12, 0.0 }
 0x481   :  { %v2854_v15 = vmax.f32 %v2626_v47, 0.0  ;;  %v5078_v12 = vpop.permute.xlu1 %2321 }
 0x482   :  { %v5058_v25 = vpack.c.bf16 %v2856_v18, %v2855_v41 }
 0x483   :  { %v5062_v7 = vpack.c.bf16 %v2854_v15, %v2853_v62  ;;  %v3590_v31 = vpop.f32.mrb[76].mxu1 }
 0x484   :  { %v2647_v11 = vadd.f32 %v3590_v31, %v2117_v34  ;;  %v2638_v23 = vpop.f32.mrb[77].mxu1 }
 0x485   :  { %v2639_v8 = vadd.f32 %v2638_v23, %v2107_v51  ;;  %v3591_v57 = vpop.f32.mrb[78].mxu1 }
 0x486   :  { %v2650_v17 = vadd.f32 %v3591_v57, %v2122_v26  ;;  %v2641_v37 = vpop.f32.mrb[79].mxu1  ;;  %v2859_v61 = vmax.f32 %v2647_v11, 0.0  ;;  %v5074_v26 = vpop.permute.xlu0 %2316 }
 0x487   :  { %v2642_v60 = vadd.f32 %v2641_v37, %v5026_v24  ;;  %v2857_v36 = vmax.f32 %v2639_v8, 0.0  ;;  %v5084_v8 = vpop.permute.xlu1 %2241 }
 0x488   :  { %v2860_v46 = vmax.f32 %v2650_v17, 0.0 }
 0x489   :  { %v2858_v3 = vmax.f32 %v2642_v60, 0.0 }
 0x48a   :  { %v5069_v55 = vpack.c.bf16 %v2860_v46, %v2859_v61  ;;  %v5081_v31 = vpop.permute.xlu0 %2236 }
 0x48b   :  { %v5071_v40 = vpack.c.bf16 %v2858_v3, %v2857_v36  ;;  %v3594_v34 = vpop.f32.mrb[80].mxu1 }
 0x48c   :  { %v2663_v51 = vadd.f32 %v3594_v34, %v4995_v35  ;;  %v2654_v52 = vpop.f32.mrb[81].mxu1 }
 0x48d   :  { %v2655_v16 = vadd.f32 %v2654_v52, %v4988_v50  ;;  %v3595_v21 = vpop.f32.mrb[82].mxu1 }
 0x48e   :  { %v2666_v24 = vadd.f32 %v3595_v21, %v4997_v1  ;;  %v2657_v6 = vpop.f32.mrb[83].mxu1  ;;  %v2863_v47 = vmax.f32 %v2663_v51, 0.0  ;;  %v5090_v46 = vpop.permute.xlu0 %2326 }
 0x48f   :  { %v2658_v29 = vadd.f32 %v2657_v6, %v4990_v63  ;;  %v2861_v18 = vmax.f32 %v2655_v16, 0.0 }
 0x490   :  { %v2864_v41 = vmax.f32 %v2666_v24, 0.0 }
 0x491   :  { %v2862_v62 = vmax.f32 %v2658_v29, 0.0 }
 0x492   :  { %v2920_v15 = vpack.c.bf16 %v2864_v41, %v2863_v47  ;;  %v5099_v24 = vpop.permute.xlu0 %2246 }
 0x493   :  { %v2919_v35 = vpack.c.bf16 %v2862_v62, %v2861_v18  ;;  %v3598_v11 = vpop.f32.mrb[84].mxu1 }
 0x494   :  { %v2679_v23 = vadd.f32 %v3598_v11, %v5003_v58  ;;  %v2670_v50 = vpop.f32.mrb[85].mxu1 }
 0x495   :  { %v2671_v1 = vadd.f32 %v2670_v50, %v4999_v44  ;;  %v3599_v57 = vpop.f32.mrb[86].mxu1  ;;  %3404 = vmatprep.subr.bf16.mxu0 %v2919_v35  ;;  %v5093_v44 = vpop.permute.xlu1 %2331 }
 0x496   :  { %v2682_v63 = vadd.f32 %v3599_v57, %v5005_v54  ;;  %v2673_v17 = vpop.f32.mrb[87].mxu1  ;;  %3405 = vmatpush3.bf16.msra.mxu0 %v5042_v39  ;;  %v2867_v60 = vmax.f32 %v2679_v23, 0.0 }
 0x497   :  { %v2674_v37 = vadd.f32 %v2673_v17, %v5001_v13  ;;  %3406 = vmatprep.subr.bf16.mxu0 %v2920_v15  ;;  %v2865_v58 = vmax.f32 %v2671_v1, 0.0 }
 0x498   :  { %v2868_v61 = vmax.f32 %v2682_v63, 0.0 }
 0x499   :  { %v2866_v36 = vmax.f32 %v2674_v37, 0.0  ;;  %v5102_v47 = vpop.permute.xlu1 %2251 }
 0x49a   :  { %v2922_v3 = vpack.c.bf16 %v2868_v61, %v2867_v60  ;;  %3407 = vmatpush3.bf16.msra.mxu0 %v5040_v59 }
 0x49b   :  { %v2921_v34 = vpack.c.bf16 %v2866_v36, %v2865_v58  ;;  %v3602_v51 = vpop.f32.mrb[88].mxu1 }
 0x49c   :  { %v2695_v54 = vadd.f32 %v3602_v51, %v5018_v2  ;;  %v2686_v52 = vpop.f32.mrb[89].mxu1 }
 0x49d   :  { %v2687_v39 = vadd.f32 %v2686_v52, %v5014_v45  ;;  %v3603_v13 = vpop.f32.mrb[90].mxu1  ;;  %3408 = vmatprep.subr.bf16.mxu0 %v2921_v34  ;;  %v5111_v50 = vpop.permute.xlu1 %2341 }
 0x49e   :  { %v2698_v16 = vadd.f32 %v3603_v13, %v5020_v5  ;;  %v2689_v21 = vpop.f32.mrb[91].mxu1  ;;  %3409 = vmatpush3.bf16.msra.mxu0 %v5052_v20  ;;  %v2871_v6 = vmax.f32 %v2695_v54, 0.0  ;;  %v5106_v20 = vpop.permute.xlu0 %2336 }
 0x49f   :  { %v2690_v59 = vadd.f32 %v2689_v21, %v5016_v14  ;;  %3410 = vmatprep.subr.bf16.mxu0 %v2922_v3  ;;  %v2869_v2 = vmax.f32 %v2687_v39, 0.0 }
 0x4a0   :  { %v2872_v29 = vmax.f32 %v2698_v16, 0.0 }
 0x4a1   :  { %v2870_v41 = vmax.f32 %v2690_v59, 0.0  ;;  %v2262_v58 = vpop.permute.xlu1 %2261 }
 0x4a2   :  { %v2924_v18 = vpack.c.bf16 %v2872_v29, %v2871_v6  ;;  %3411 = vmatpush3.bf16.msra.mxu0 %v5048_v49 }
 0x4a3   :  { %v2923_v45 = vpack.c.bf16 %v2870_v41, %v2869_v2  ;;  %v3606_v62 = vpop.f32.mrb[92].mxu1 }
 0x4a4   :  { %v2711_v5 = vadd.f32 %v3606_v62, %v5028_v28  ;;  %v2702_v15 = vpop.f32.mrb[93].mxu1 }
 0x4a5   :  { %v2703_v35 = vadd.f32 %v2702_v15, %v5022_v27  ;;  %v3607_v14 = vpop.f32.mrb[94].mxu1  ;;  %3412 = vmatprep.subr.bf16.mxu0 %v2923_v45  ;;  %v2257_v27 = vpop.permute.xlu0 %2256 }
 0x4a6   :  { %v2714_v11 = vadd.f32 %v3607_v14, %v5030_v9  ;;  %v2705_v23 = vpop.f32.mrb[95].mxu1  ;;  %3413 = vmatpush3.bf16.msra.mxu0 %v5062_v7  ;;  %v2875_v1 = vmax.f32 %v2711_v5, 0.0 }
 0x4a7   :  { %v2706_v49 = vadd.f32 %v2705_v23, %v5024_v42  ;;  %3414 = vmatprep.subr.bf16.mxu0 %v2924_v18  ;;  %v2873_v28 = vmax.f32 %v2703_v35, 0.0 }
 0x4a8   :  { %v2876_v57 = vmax.f32 %v2714_v11, 0.0 }
 0x4a9   :  { %v2874_v63 = vmax.f32 %v2706_v49, 0.0  ;;  %v5125_v54 = vpop.permute.xlu0 %2346 }
 0x4aa   :  { %v2926_v17 = vpack.c.bf16 %v2876_v57, %v2875_v1  ;;  %3415 = vmatpush3.bf16.msra.mxu0 %v5058_v25  ;;  %v5123_v25 = vld [vmem:[%s5207_s9 + $0x8] sm:$0xff]  ;;  %s3805_s9 = smov [#allocation2]  }
 0x4ab   :  { %v2925_v37 = vpack.c.bf16 %v2874_v63, %v2873_v28  ;;  %v3610_v60 = vpop.f32.mrb[96].mxu1  ;;  %s3056_s19 = sshll.u32 %s3805_s9, 4  ;;  %s3057_s19 = int_to_ptr.vmem [resolvable:$true] %s3056_s19 }
 0x4ac   :  { %v2727_v9 = vadd.f32 %v3610_v60, %v5050_v4  ;;  %v2718_v61 = vpop.f32.mrb[97].mxu1  ;;  %s3780_s20 = scalar_lea.vmem %s3057_s19, 16  ;;  %s3784_s21 = scalar_lea.vmem %s3057_s19, 32 }
 0x4ad   :  { %v2719_v7 = vadd.f32 %v2718_v61, %v5036_v53  ;;  %v3611_v36 = vpop.f32.mrb[98].mxu1  ;;  %3416 = vmatprep.subr.bf16.mxu0 %v2925_v37  ;;  %p3781_p0 = scmp.ne.s32.totalorder %s3057_s19, %s3780_s20  ;;  %p3785_p1 = scmp.lt.s32.totalorder %s3057_s19, %s3057_s19 }
 0x4ae   :  { %v2730_v42 = vadd.f32 %v3611_v36, %v5054_v32  ;;  %v2721_v3 = vpop.f32.mrb[99].mxu1  ;;  %3417 = vmatpush3.bf16.msra.mxu0 %v5071_v40  ;;  %v2879_v4 = vmax.f32 %v2727_v9, 0.0  ;;  %v3176_v32 = vcombine.low %v5010_v10, %v5010_v10  ;;  %v5134_v40 = vpop.permute.xlu1 %2351  ;;  %p3786_p2 = scmp.lt.s32.totalorder %s3784_s21, %s3780_s20 }
 0x4af   :  { %v2722_v34 = vadd.f32 %v2721_v3, %v5038_v30  ;;  %3418 = vmatprep.subr.bf16.mxu0 %v2926_v17  ;;  %v2877_v53 = vmax.f32 %v2719_v7, 0.0  ;;  %v3179_v30 = vcombine.high %v5123_v25, %v5123_v25 }
 0x4b0   :  { %v2880_v51 = vmax.f32 %v2730_v42, 0.0  ;;  %p3787_p3 = por %p3786_p2, %p3785_p1 }
 0x4b1   :  { %v2878_v52 = vmax.f32 %v2722_v34, 0.0 }
 0x4b2   :  { %v5129_v39 = vpack.c.bf16 %v2880_v51, %v2879_v4  ;;  %3419 = vmatpush3.bf16.msra.mxu0 %v5069_v55  ;;  %v2267_v55 = vpop.permute.xlu0 %2266  ;;  %v2272_v62 = vpop.permute.xlu1 %2271  ;;  %p3788_p4 = pnand %p3787_p3, %p3781_p0 }
 0x4b3   :  { %v5136_v13 = vpack.c.bf16 %v2878_v52, %v2877_v53  ;;  %v3614_v16 = vpop.f32.mrb[100].mxu1 }
 0x4b4   :  { %v2743_v21 = vadd.f32 %v3614_v16, %v5081_v31  ;;  %v2734_v59 = vpop.f32.mrb[101].mxu1 }
 0x4b5   :  { %v2735_v6 = vadd.f32 %v2734_v59, %v5064_v33  ;;  %v3615_v29 = vpop.f32.mrb[102].mxu1  ;;  %2996 = vmatmul.mubr.bf16.vlgmr.msra.gmra.mrb[80].mxu0 %v3176_v32 }
 0x4b6   :  { %v2746_v10 = vadd.f32 %v3615_v29, %v5084_v8  ;;  %v2737_v2 = vpop.f32.mrb[103].mxu1  ;;  %3035 = vmatprep.mubr.bf16.mxu0 %v3179_v30  ;;  %v2883_v18 = vmax.f32 %v2743_v21, 0.0  ;;  %v5146_v23 = vpop.permute.xlu0 %2356 }
 0x4b7   :  { %v2738_v41 = vadd.f32 %v2737_v2, %v5067_v56  ;;  %v2881_v5 = vmax.f32 %v2735_v6, 0.0  ;;  %v5149_v56 = vpop.permute.xlu1 %2361 }
 0x4b8   :  { %v2884_v45 = vmax.f32 %v2746_v10, 0.0 }
 0x4b9   :  { %v2882_v15 = vmax.f32 %v2738_v41, 0.0 }
 0x4ba   :  { %v5142_v35 = vpack.c.bf16 %v2884_v45, %v2883_v18  ;;  %v2277_v61 = vpop.permute.xlu0 %2276 }
 0x4bb   :  { %v5144_v31 = vpack.c.bf16 %v2882_v15, %v2881_v5  ;;  %v3618_v14 = vpop.f32.mrb[104].mxu1 }
 0x4bc   :  { %v2759_v33 = vadd.f32 %v3618_v14, %v2257_v27  ;;  %v2750_v11 = vpop.f32.mrb[105].mxu1 }
 0x4bd   :  { %v2751_v8 = vadd.f32 %v2750_v11, %v5099_v24  ;;  %v3619_v49 = vpop.f32.mrb[106].mxu1  ;;  %v2282_v24 = vpop.permute.xlu1 %2281 }
 0x4be   :  { %v2762_v1 = vadd.f32 %v3619_v49, %v2262_v58  ;;  %v2753_v57 = vpop.f32.mrb[107].mxu1  ;;  %v2887_v63 = vmax.f32 %v2759_v33, 0.0 }
 0x4bf   :  { %v2754_v28 = vadd.f32 %v2753_v57, %v5102_v47  ;;  %v2885_v37 = vmax.f32 %v2751_v8, 0.0 }
 0x4c0   :  { %v2888_v17 = vmax.f32 %v2762_v1, 0.0 }
 0x4c1   :  { %v2886_v60 = vmax.f32 %v2754_v28, 0.0 }
 0x4c2   :  { %v5152_v9 = vpack.c.bf16 %v2888_v17, %v2887_v63 }
 0x4c3   :  { %v5154_v27 = vpack.c.bf16 %v2886_v60, %v2885_v37  ;;  %v3622_v7 = vpop.f32.mrb[108].mxu1 }
 0x4c4   :  { %v2775_v36 = vadd.f32 %v3622_v7, %v2277_v61  ;;  %v2766_v42 = vpop.f32.mrb[109].mxu1 }
 0x4c5   :  { %v2767_v3 = vadd.f32 %v2766_v42, %v2267_v55  ;;  %v3623_v58 = vpop.f32.mrb[110].mxu1 }
 0x4c6   :  { %v2778_v34 = vadd.f32 %v3623_v58, %v2282_v24  ;;  %v2769_v4 = vpop.f32.mrb[111].mxu1  ;;  %v2891_v53 = vmax.f32 %v2775_v36, 0.0 }
 0x4c7   :  { %v2770_v51 = vadd.f32 %v2769_v4, %v2272_v62  ;;  %v2889_v52 = vmax.f32 %v2767_v3, 0.0 }
 0x4c8   :  { %v2892_v47 = vmax.f32 %v2778_v34, 0.0 }
 0x4c9   :  { %v2890_v32 = vmax.f32 %v2770_v51, 0.0 }
 0x4ca   :  { %v5156_v30 = vpack.c.bf16 %v2892_v47, %v2891_v53 }
 0x4cb   :  { %v5158_v16 = vpack.c.bf16 %v2890_v32, %v2889_v52  ;;  %v3626_v21 = vpop.f32.mrb[112].mxu1 }
 0x4cc   :  { %v2791_v59 = vadd.f32 %v3626_v21, %v5044_v38  ;;  %v2782_v6 = vpop.f32.mrb[113].mxu1 }
 0x4cd   :  { %v2783_v29 = vadd.f32 %v2782_v6, %v5032_v19  ;;  %v3627_v10 = vpop.f32.mrb[114].mxu1 }
 0x4ce   :  { %v2794_v2 = vadd.f32 %v3627_v10, %v5046_v0  ;;  %v2785_v55 = vpop.f32.mrb[115].mxu1  ;;  %v2895_v18 = vmax.f32 %v2791_v59, 0.0 }
 0x4cf   :  { %v2786_v41 = vadd.f32 %v2785_v55, %v5034_v22  ;;  %v2893_v62 = vmax.f32 %v2783_v29, 0.0  ;;  %v2947_v29 = vpop.permute.xlu0 %2946 }
 0x4d0   :  { %v2896_v45 = vmax.f32 %v2794_v2, 0.0 }
 0x4d1   :  { %v2894_v5 = vmax.f32 %v2786_v41, 0.0 }
 0x4d2   :  { %v2936_v15 = vpack.c.bf16 %v2896_v45, %v2895_v18 }
 0x4d3   :  { %v2935_v14 = vpack.c.bf16 %v2894_v5, %v2893_v62  ;;  %v3630_v33 = vpop.f32.mrb[116].mxu1 }
 0x4d4   :  { %v2807_v11 = vadd.f32 %v3630_v33, %v5074_v26  ;;  %v2798_v8 = vpop.f32.mrb[117].mxu1 }
 0x4d5   :  { %v2799_v38 = vadd.f32 %v2798_v8, %v5056_v43  ;;  %v3631_v49 = vpop.f32.mrb[118].mxu1  ;;  %3426 = vmatprep.subr.bf16.mxu0 %v2935_v14 }
 0x4d6   :  { %v2810_v19 = vadd.f32 %v3631_v49, %v5078_v12  ;;  %v2801_v0 = vpop.f32.mrb[119].mxu1  ;;  %3427 = vmatpush3.bf16.msra.mxu0 %v5136_v13  ;;  %v2899_v1 = vmax.f32 %v2807_v11, 0.0 }
 0x4d7   :  { %v2802_v22 = vadd.f32 %v2801_v0, %v5060_v48  ;;  %3428 = vmatprep.subr.bf16.mxu0 %v2936_v15  ;;  %v2897_v28 = vmax.f32 %v2799_v38, 0.0 }
 0x4d8   :  { %v2900_v57 = vmax.f32 %v2810_v19, 0.0 }
 0x4d9   :  { %v2898_v63 = vmax.f32 %v2802_v22, 0.0 }
 0x4da   :  { %v2938_v17 = vpack.c.bf16 %v2900_v57, %v2899_v1  ;;  %3429 = vmatpush3.bf16.msra.mxu0 %v5129_v39 }
 0x4db   :  { %v2937_v26 = vpack.c.bf16 %v2898_v63, %v2897_v28  ;;  %v3634_v37 = vpop.f32.mrb[120].mxu1 }
 0x4dc   :  { %v2823_v43 = vadd.f32 %v3634_v37, %v5106_v20  ;;  %v2814_v60 = vpop.f32.mrb[121].mxu1 }
 0x4dd   :  { %v2815_v12 = vadd.f32 %v2814_v60, %v5090_v46  ;;  %v3635_v61 = vpop.f32.mrb[122].mxu1  ;;  %3430 = vmatprep.subr.bf16.mxu0 %v2937_v26 }
 0x4de   :  { %v2826_v13 = vadd.f32 %v3635_v61, %v5111_v50  ;;  %v2817_v48 = vpop.f32.mrb[123].mxu1  ;;  %3431 = vmatpush3.bf16.msra.mxu0 %v5144_v31  ;;  %v2903_v36 = vmax.f32 %v2823_v43, 0.0 }
 0x4df   :  { %v2818_v7 = vadd.f32 %v2817_v48, %v5093_v44  ;;  %3432 = vmatprep.subr.bf16.mxu0 %v2938_v17  ;;  %v2901_v39 = vmax.f32 %v2815_v12, 0.0 }
 0x4e0   :  { %v2904_v42 = vmax.f32 %v2826_v13, 0.0 }
 0x4e1   :  { %v2902_v24 = vmax.f32 %v2818_v7, 0.0 }
 0x4e2   :  { %v2940_v3 = vpack.c.bf16 %v2904_v42, %v2903_v36  ;;  %3433 = vmatpush3.bf16.msra.mxu0 %v5142_v35 }
 0x4e3   :  { %v2939_v20 = vpack.c.bf16 %v2902_v24, %v2901_v39  ;;  %v3638_v58 = vpop.f32.mrb[124].mxu1 }
 0x4e4   :  { %v2839_v46 = vadd.f32 %v3638_v58, %v5146_v23  ;;  %v2830_v34 = vpop.f32.mrb[125].mxu1 }
 0x4e5   :  { %v2831_v50 = vadd.f32 %v2830_v34, %v5125_v54  ;;  %v3639_v4 = vpop.f32.mrb[126].mxu1  ;;  %3434 = vmatprep.subr.bf16.mxu0 %v2939_v20  ;;  %v3178_v54 = vcombine.low %v5123_v25, %v5123_v25 }
 0x4e6   :  { %v2842_v31 = vadd.f32 %v3639_v4, %v5149_v56  ;;  %v2833_v44 = vpop.f32.mrb[127].mxu1  ;;  %3435 = vmatpush3.bf16.msra.mxu0 %v5154_v27  ;;  %v2907_v53 = vmax.f32 %v2839_v46, 0.0 }
 0x4e7   :  { %v2834_v51 = vadd.f32 %v2833_v44, %v5134_v40  ;;  %3436 = vmatprep.subr.bf16.mxu0 %v2940_v3  ;;  %v2905_v35 = vmax.f32 %v2831_v50, 0.0 }
 0x4e8   :  { %v2908_v47 = vmax.f32 %v2842_v31, 0.0 }
 0x4e9   :  { %v2906_v52 = vmax.f32 %v2834_v51, 0.0 }
 0x4ea   :  { %v2942_v32 = vpack.c.bf16 %v2908_v47, %v2907_v53  ;;  %3437 = vmatpush3.bf16.msra.mxu0 %v5152_v9 }
 0x4eb   :  { %v2941_v23 = vpack.c.bf16 %v2906_v52, %v2905_v35 }
 0x4ed   :  { %3438 = vmatprep.subr.bf16.mxu0 %v2941_v23 }
 0x4ee   :  { %3439 = vmatpush3.bf16.msra.mxu0 %v5158_v16 }
 0x4ef   :  { %3440 = vmatprep.subr.bf16.mxu0 %v2942_v32 }
 0x4f2   :  { %3441 = vmatpush3.bf16.msra.mxu0 %v5156_v30 }
 0x4f5   :  { %3036 = vmatmul.mubr.bf16.vlgmr.msra.gmra.mrb[84].mxu0 %v3178_v54 }
 0x588   :  { %v3420_v40 = vpop.f32.mrb[80].mxu0 }
 0x589   :  { %v3421_v56 = vpop.f32.mrb[81].mxu0 }
 0x58a   :  { %v3422_v27 = vadd.f32 %v3421_v56, %v3420_v40  ;;  %v3423_v21 = vpop.f32.mrb[82].mxu0 }
 0x58b   :  { %v3424_v59 = vpop.f32.mrb[83].mxu0 }
 0x58c   :  { %v2998_v9 = vadd.f32 %v3422_v27, %v2947_v29 }
 0x5c8   :  { %v3442_v6 = vpop.f32.mrb[84].mxu0 }
 0x5c9   :  { %v3443_v10 = vpop.f32.mrb[85].mxu0 }
 0x5ca   :  { %v3444_v2 = vadd.f32 %v3443_v10, %v3442_v6  ;;  %v3445_v55 = vpop.f32.mrb[86].mxu0 }
 0x5cb   :  { %v3446_v41 = vpop.f32.mrb[87].mxu0 }
 0x5cc   :  { %v3038_v16 = vadd.f32 %v3444_v2, %v2998_v9 }
 0x5ce   :  { %v3043_v18 = vsub.f32 0.0, %v3038_v16 }
 0x5d0   :  { %v3044_v45 = vmul.f32 1.442695, %v3043_v18 }
 0x5d2   :  { %3776 = vpow2.f32 %v3044_v45 }
 0x5dc   :  { %v3777_v25 = vpop.eup %3776 }
 0x5dd   :  { %v3046_v62 = vadd.f32 1.0, %v3777_v25 }
 0x5df   :  { %3778 = vrcp.f32 %v3046_v62 }
 0x5e9   :  { %v3779_v30 = vpop.eup %3778 }
 0x5ea   :  { %3049 = vst [vmem:[#allocation2] sm:$0x1] %v3779_v30 }
 0x5eb   :  { %3791 = shalt.err (!%p3788_p4)
}
 0x5ec   :  { %s3792_s24 = scalar_lea.hbm %s5209_s11, 16 }
 0x5ed   :  { %p3793_p5 = scmp.ne.s32.totalorder %s5209_s11, %s3792_s24  ;;  %p3796_p6 = scmp.lt.u32.totalorder %s3792_s24, %s5209_s11 }
 0x5ef   :  { %p3798_p7 = pnand %p3796_p6, %p3793_p5 }
 0x5f1   :  { %3801 = shalt.err (!%p3798_p7)
}
 0x5f2   :  { %3059 = dma.vmem_to_hbm [thread:$0]  %s3057_s19, 16, %s5209_s11, [#allocation3]  }
 0x5f3   :  { %3802 = dma.done.wait [#allocation3], 16  }
 0x5f4   :  { %3803 = vsyncadd [#allocation3], 4294967280 }
 0x5f5   :  { %3063 = vsyncpa [#allocation3], 1 }

</bundles_post_ra>
